<compile_context>
chip_gen: v7x
topology: tpu7x:2x2x1
jax: 0.10.0
libtpu: 0.0.40
codegen_flags: <defaults>
</compile_context>

<pallas_src>
import jax
import jax.numpy as jnp
from jax.experimental import pallas as pl
from jax.experimental.pallas import tpu as pltpu

F = 512                              # per-backbone feature width (classify = Linear(2*F, NC))
_VMEM_BUDGET = 24 * 1024 * 1024      # per-step working-set target; safe on v5e/v6e/v7x


def multimodel_kernel(x1_ref, x2_ref,    # (TB, C*H*W) f32 flattened images
                      w1_ref, w2_ref,    # (C*H*W, NPAD) bf16 folded pool+proj+heads
                      out_ref):          # (TB, NPAD)   f32 packed logits
    # bf16 cast happens in VMEM on the VPU (free under the DMA/MXU bottleneck);
    # both matmuls run on the MXU with f32 accumulation. All three heads come
    # out of these two dots because the heads were folded into W1 / W2.
    x1 = x1_ref[...].astype(jnp.bfloat16)
    x2 = x2_ref[...].astype(jnp.bfloat16)
    out_ref[...] = (
        jnp.dot(x1, w1_ref[...], preferred_element_type=jnp.float32)
        + jnp.dot(x2, w2_ref[...], preferred_element_type=jnp.float32))


# ----------------------------- tiling helpers --------------------------------

def _weight_bytes(chw, npad):
    return 2 * chw * npad * 2                     # two bf16 (CHW, NPAD) weights


def _step_bytes(tb, chw, npad):
    # Per-grid-step working set: resident (single-buffered) weights +
    # double-buffered f32 image blocks + double-buffered f32 output block.
    return (_weight_bytes(chw, npad)
            + 2 * 2 * tb * chw * 4
            + 2 * tb * npad * 4)


def _choose_batch_tile(batch, chw, npad):
    """Largest batch tile (multiple of 8) whose working set fits the VMEM
    budget, capped so the grid keeps >= 4 steps when the batch allows."""
    b8 = -(-batch // 8) * 8
    tb = 8
    while tb * 2 <= min(b8, 512) and _step_bytes(tb * 2, chw, npad) <= _VMEM_BUDGET:
        tb *= 2
    while tb > 8 and -(-b8 // tb) < 4:            # keep >= 4 pipeline steps
        tb //= 2
    return tb


def _vmem_limit_bytes(tb, chw, npad):
    # 2x headroom (also covers the double-buffered-weight fallback), clamped to
    # [16 MiB, 64 MiB] so it is valid on every generation (v7x physical = 64 MiB).
    used = _step_bytes(tb, chw, npad)
    return int(min(64 * 1024 * 1024, max(2 * used, 16 * 1024 * 1024)))


# ------------------------------- pallas call ----------------------------------

def _pallas_forward(x1_flat, x2_flat, w1, w2, *, tb, b_pad, chw, npad,
                    single_buffer_weights):
    def w_spec():
        if single_buffer_weights:
            # Constant index_map -> no re-fetch; single-buffer to halve weight VMEM.
            return pl.BlockSpec((chw, npad), lambda i: (0, 0),
                                pipeline_mode=pl.Buffered(1))
        return pl.BlockSpec((chw, npad), lambda i: (0, 0))

    return pl.pallas_call(
        multimodel_kernel,
        out_shape=jax.ShapeDtypeStruct((b_pad, npad), jnp.float32),
        grid=(b_pad // tb,),
        in_specs=[
            pl.BlockSpec((tb, chw), lambda i: (i, 0)),
            pl.BlockSpec((tb, chw), lambda i: (i, 0)),
            w_spec(),
            w_spec(),
        ],
        out_specs=pl.BlockSpec((tb, npad), lambda i: (i, 0)),
        compiler_params=pltpu.CompilerParams(
            dimension_semantics=("parallel",),
            vmem_limit_bytes=_vmem_limit_bytes(tb, chw, npad)),
    )(x1_flat, x2_flat, w1, w2)


def multi_model_forward(x1, x2, params):
    """x1, x2: (B, C, H, W) float images.  params: see make_params."""
    B, C, H, W = x1.shape
    NC = params["w_cat"].shape[1]
    HW = H * W
    CHW = C * HW
    NPAD = ((3 * NC + 127) // 128) * 128          # lane-dense packed head width

    # ---- one-time wrapper-side weight folding (tiny arrays) -----------------
    # Pack the heads into a (2F, NPAD) lane-dense layout:
    #   cols [0:NC)     classify      (top half = w_cat[:F], bottom = w_cat[F:])
    #   cols [NC:2NC)   classify_mri  (top half only)
    #   cols [2NC:3NC)  classify_pet  (bottom half only)
    hi = jax.lax.Precision.HIGHEST
    w_top = jnp.zeros((F, NPAD), jnp.float32)
    w_top = w_top.at[:, :NC].set(params["w_cat"][:F])
    w_top = w_top.at[:, NC:2 * NC].set(params["w_mri"])
    w_bot = jnp.zeros((F, NPAD), jnp.float32)
    w_bot = w_bot.at[:, :NC].set(params["w_cat"][F:])
    w_bot = w_bot.at[:, 2 * NC:3 * NC].set(params["w_pet"])

    # Compose heads into the linear stand-in backbones, fold the 1/(H*W) mean,
    # and replicate across spatial positions directly in bf16 (no f32 copy):
    # the whole forward collapses to  x_flat @ W  per modality.
    # TODO(synk): only valid while res1/res2 are the linear stand-ins.
    w1_small = jnp.dot(params["w_bb1"], w_top, precision=hi) / HW      # (C, NPAD)
    w2_small = jnp.dot(params["w_bb2"], w_bot, precision=hi) / HW
    w1 = jnp.repeat(w1_small.astype(jnp.bfloat16), HW, axis=0)         # (CHW, NPAD) bf16
    w2 = jnp.repeat(w2_small.astype(jnp.bfloat16), HW, axis=0)

    # Images: reshape only (free); keep f32 so HBM is read once, cast in-kernel.
    x1_flat = x1.reshape(B, CHW)
    x2_flat = x2.reshape(B, CHW)

    tb = _choose_batch_tile(B, CHW, NPAD)
    b_pad = -(-B // tb) * tb
    if b_pad != B:                                # pad batch to a tile multiple
        x1_flat = jnp.pad(x1_flat, ((0, b_pad - B), (0, 0)))
        x2_flat = jnp.pad(x2_flat, ((0, b_pad - B), (0, 0)))

    try:
        packed = _pallas_forward(x1_flat, x2_flat, w1, w2, tb=tb, b_pad=b_pad,
                                 chw=CHW, npad=NPAD, single_buffer_weights=True)
    except Exception:
        # JAX version without BlockSpec(pipeline_mode=...) support: fall back to
        # default double-buffered weights (identical numerics, a bit more VMEM).
        packed = _pallas_forward(x1_flat, x2_flat, w1, w2, tb=tb, b_pad=b_pad,
                                 chw=CHW, npad=NPAD, single_buffer_weights=False)

    cls = packed[:B, :NC]
    cls_mri = packed[:B, NC:2 * NC]
    cls_pet = packed[:B, 2 * NC:3 * NC]
    return cls, cls_mri, cls_pet


# ------------------------------ params / reference ----------------------------

def make_params(key, in_ch, num_classes):
    """nn.Linear-style init (uniform +/- 1/sqrt(fan_in)); weights stored (in, out)."""
    ks = jax.random.split(key, 5)

    def lin(k, fan_in, fan_out):
        bound = 1.0 / jnp.sqrt(jnp.float32(fan_in))
        return jax.random.uniform(k, (fan_in, fan_out), jnp.float32, -bound, bound)

    return {
        "w_bb1": lin(ks[0], in_ch, F),            # stand-in res1 tail (pool -> 512)
        "w_bb2": lin(ks[1], in_ch, F),            # stand-in res2 tail (pool -> 512)
        "w_cat": lin(ks[2], 2 * F, num_classes),  # classify: Linear(1024, NC, bias=False)
        "w_mri": lin(ks[3], F, num_classes),      # classify_mri: Linear(512, NC, bias=False)
        "w_pet": lin(ks[4], F, num_classes),      # classify_pet: Linear(512, NC, bias=False)
    }


def reference_forward(x1, x2, params):
    """Pure-JAX f32 reference mirroring the PyTorch forward (same stand-in backbones)."""
    dot = lambda a, b: jnp.dot(a, b, precision=jax.lax.Precision.HIGHEST)
    f1 = dot(jnp.mean(x1, axis=(2, 3)), params["w_bb1"])
    f2 = dot(jnp.mean(x2, axis=(2, 3)), params["w_bb2"])
    res = jnp.concatenate([f1, f2], axis=-1)
    cls = dot(res, params["w_cat"])
    cls_mri = dot(f1, params["w_mri"])
    cls_pet = dot(f2, params["w_pet"])
    return cls, cls_mri, cls_pet


if __name__ == "__main__":
    B, C, H, W = 2, 4, 16, 16
    NUM_CLASSES = 3

    key = jax.random.PRNGKey(0)
    k_x1, k_x2, k_p = jax.random.split(key, 3)
    x1 = jax.random.normal(k_x1, (B, C, H, W), jnp.float32)
    x2 = jax.random.normal(k_x2, (B, C, H, W), jnp.float32)
    params = make_params(k_p, C, NUM_CLASSES)

    cls, cls_mri, cls_pet = multi_model_forward(x1, x2, params)
    jax.block_until_ready((cls, cls_mri, cls_pet))

    ref_cls, ref_mri, ref_pet = reference_forward(x1, x2, params)
    assert jnp.allclose(cls, ref_cls, atol=1e-3, rtol=2e-2)
    assert jnp.allclose(cls_mri, ref_mri, atol=1e-3, rtol=2e-2)
    assert jnp.allclose(cls_pet, ref_pet, atol=1e-3, rtol=2e-2)

    print("KERNEL_OK")
</pallas_src>

<mosaic_0001>
module attributes {stable_mosaic.version = 11 : i64} {
  func.func @multimodel_kernel(%arg0: i32, %arg1: memref<8x1024xf32, #tpu.memory_space<vmem>>, %arg2: memref<8x1024xf32, #tpu.memory_space<vmem>>, %arg3: memref<1024x128xbf16, #tpu.memory_space<vmem>>, %arg4: memref<1024x128xbf16, #tpu.memory_space<vmem>>, %arg5: memref<8x128xf32, #tpu.memory_space<vmem>>) attributes {dimension_semantics = [#tpu.dimension_semantics<parallel>], iteration_bounds = array<i64: 1>, scalar_prefetch = 0 : i64, scratch_operands = 0 : i64, tpu.core_type = #tpu.core_type<tc>, window_params = [{transform_indices = @transform_0, window_bounds = array<i64: 8, 1024>}, {transform_indices = @transform_1, window_bounds = array<i64: 8, 1024>}, {pipeline_mode = #tpu.pipeline_mode<synchronous>, transform_indices = @transform_2, window_bounds = array<i64: 1024, 128>}, {pipeline_mode = #tpu.pipeline_mode<synchronous>, transform_indices = @transform_3, window_bounds = array<i64: 1024, 128>}, {transform_indices = @transform_4, window_bounds = array<i64: 8, 128>}]} {
    %c0 = arith.constant 0 : index
    %c0_0 = arith.constant 0 : index
    %0 = vector.load %arg1[%c0, %c0_0] : memref<8x1024xf32, #tpu.memory_space<vmem>>, vector<8x1024xf32>
    %1 = arith.truncf %0 : vector<8x1024xf32> to vector<8x1024xbf16>
    %c0_1 = arith.constant 0 : index
    %c0_2 = arith.constant 0 : index
    %2 = vector.load %arg2[%c0_1, %c0_2] : memref<8x1024xf32, #tpu.memory_space<vmem>>, vector<8x1024xf32>
    %3 = arith.truncf %2 : vector<8x1024xf32> to vector<8x1024xbf16>
    %c0_3 = arith.constant 0 : index
    %c0_4 = arith.constant 0 : index
    %4 = vector.load %arg3[%c0_3, %c0_4] : memref<1024x128xbf16, #tpu.memory_space<vmem>>, vector<1024x128xbf16>
    %cst = arith.constant dense<0.000000e+00> : vector<8x128xf32>
    %5 = tpu.matmul %1, %4, %cst {dimension_numbers = #tpu.dot_dimension_numbers<[1], [0], [0], [1], [0, 0, 1, 1], [], []>} : vector<8x1024xbf16>, vector<1024x128xbf16>, vector<8x128xf32> -> vector<8x128xf32>
    %c0_5 = arith.constant 0 : index
    %c0_6 = arith.constant 0 : index
    %6 = vector.load %arg4[%c0_5, %c0_6] : memref<1024x128xbf16, #tpu.memory_space<vmem>>, vector<1024x128xbf16>
    %cst_7 = arith.constant dense<0.000000e+00> : vector<8x128xf32>
    %7 = tpu.matmul %3, %6, %cst_7 {dimension_numbers = #tpu.dot_dimension_numbers<[1], [0], [0], [1], [0, 0, 1, 1], [], []>} : vector<8x1024xbf16>, vector<1024x128xbf16>, vector<8x128xf32> -> vector<8x128xf32>
    %8 = arith.addf %5, %7 : vector<8x128xf32>
    %c0_8 = arith.constant 0 : index
    %c0_9 = arith.constant 0 : index
    %9 = vector.load %arg5[%c0_8, %c0_9] : memref<8x128xf32, #tpu.memory_space<vmem>>, vector<8x128xf32>
    tpu.vector_store %arg5[%c0_8, %c0_9], %8 {strides = array<i32>} : memref<8x128xf32, #tpu.memory_space<vmem>>, vector<8x128xf32>,
    return
  }
  func.func @transform_0(%arg0: i32) -> (i32, i32) {
    %c0_i32 = arith.constant 0 : i32
    %c0_i32_0 = arith.constant 0 : i32
    return %arg0, %c0_i32 : i32, i32
  }
  func.func @transform_1(%arg0: i32) -> (i32, i32) {
    %c0_i32 = arith.constant 0 : i32
    %c0_i32_0 = arith.constant 0 : i32
    return %arg0, %c0_i32 : i32, i32
  }
  func.func @transform_2(%arg0: i32) -> (i32, i32) {
    %c0_i32 = arith.constant 0 : i32
    %c0_i32_0 = arith.constant 0 : i32
    %c0_i32_1 = arith.constant 0 : i32
    return %c0_i32, %c0_i32_0 : i32, i32
  }
  func.func @transform_3(%arg0: i32) -> (i32, i32) {
    %c0_i32 = arith.constant 0 : i32
    %c0_i32_0 = arith.constant 0 : i32
    %c0_i32_1 = arith.constant 0 : i32
    return %c0_i32, %c0_i32_0 : i32, i32
  }
  func.func @transform_4(%arg0: i32) -> (i32, i32) {
    %c0_i32 = arith.constant 0 : i32
    %c0_i32_0 = arith.constant 0 : i32
    return %arg0, %c0_i32 : i32, i32
  }
}

module attributes {stable_mosaic.version = 11 : i64} {
  func.func @multimodel_kernel(%arg0: i32, %arg1: memref<8x1024xf32, #tpu.memory_space<vmem>>, %arg2: memref<8x1024xf32, #tpu.memory_space<vmem>>, %arg3: memref<1024x128xbf16, #tpu.memory_space<vmem>>, %arg4: memref<1024x128xbf16, #tpu.memory_space<vmem>>, %arg5: memref<8x128xf32, #tpu.memory_space<vmem>>) attributes {dimension_semantics = [#tpu.dimension_semantics<parallel>], iteration_bounds = array<i64: 1>, scalar_prefetch = 0 : i64, scratch_operands = 0 : i64, tpu.core_type = #tpu.core_type<tc>, window_params = [{transform_indices = @transform_0, window_bounds = array<i64: 8, 1024>}, {transform_indices = @transform_1, window_bounds = array<i64: 8, 1024>}, {pipeline_mode = #tpu.pipeline_mode<synchronous>, transform_indices = @transform_2, window_bounds = array<i64: 1024, 128>}, {pipeline_mode = #tpu.pipeline_mode<synchronous>, transform_indices = @transform_3, window_bounds = array<i64: 1024, 128>}, {transform_indices = @transform_4, window_bounds = array<i64: 8, 128>}]} {
    %c0 = arith.constant 0 : index
    %c0_0 = arith.constant 0 : index
    %0 = vector.load %arg1[%c0, %c0_0] : memref<8x1024xf32, #tpu.memory_space<vmem>>, vector<8x1024xf32>
    %1 = arith.truncf %0 : vector<8x1024xf32> to vector<8x1024xbf16>
    %c0_1 = arith.constant 0 : index
    %c0_2 = arith.constant 0 : index
    %2 = vector.load %arg2[%c0_1, %c0_2] : memref<8x1024xf32, #tpu.memory_space<vmem>>, vector<8x1024xf32>
    %3 = arith.truncf %2 : vector<8x1024xf32> to vector<8x1024xbf16>
    %c0_3 = arith.constant 0 : index
    %c0_4 = arith.constant 0 : index
    %4 = vector.load %arg3[%c0_3, %c0_4] : memref<1024x128xbf16, #tpu.memory_space<vmem>>, vector<1024x128xbf16>
    %cst = arith.constant dense<0.000000e+00> : vector<8x128xf32>
    %5 = tpu.matmul %1, %4, %cst {dimension_numbers = #tpu.dot_dimension_numbers<[1], [0], [0], [1], [0, 0, 1, 1], [], []>} : vector<8x1024xbf16>, vector<1024x128xbf16>, vector<8x128xf32> -> vector<8x128xf32>
    %c0_5 = arith.constant 0 : index
    %c0_6 = arith.constant 0 : index
    %6 = vector.load %arg4[%c0_5, %c0_6] : memref<1024x128xbf16, #tpu.memory_space<vmem>>, vector<1024x128xbf16>
    %cst_7 = arith.constant dense<0.000000e+00> : vector<8x128xf32>
    %7 = tpu.matmul %3, %6, %cst_7 {dimension_numbers = #tpu.dot_dimension_numbers<[1], [0], [0], [1], [0, 0, 1, 1], [], []>} : vector<8x1024xbf16>, vector<1024x128xbf16>, vector<8x128xf32> -> vector<8x128xf32>
    %8 = arith.addf %5, %7 : vector<8x128xf32>
    %c0_8 = arith.constant 0 : index
    %c0_9 = arith.constant 0 : index
    %9 = vector.load %arg5[%c0_8, %c0_9] : memref<8x128xf32, #tpu.memory_space<vmem>>, vector<8x128xf32>
    tpu.vector_store %arg5[%c0_8, %c0_9], %8 {strides = array<i32>} : memref<8x128xf32, #tpu.memory_space<vmem>>, vector<8x128xf32>,
    return
  }
  func.func @transform_0(%arg0: i32) -> (i32, i32) {
    %c0_i32 = arith.constant 0 : i32
    %c0_i32_0 = arith.constant 0 : i32
    return %arg0, %c0_i32 : i32, i32
  }
  func.func @transform_1(%arg0: i32) -> (i32, i32) {
    %c0_i32 = arith.constant 0 : i32
    %c0_i32_0 = arith.constant 0 : i32
    return %arg0, %c0_i32 : i32, i32
  }
  func.func @transform_2(%arg0: i32) -> (i32, i32) {
    %c0_i32 = arith.constant 0 : i32
    %c0_i32_0 = arith.constant 0 : i32
    %c0_i32_1 = arith.constant 0 : i32
    return %c0_i32, %c0_i32_0 : i32, i32
  }
  func.func @transform_3(%arg0: i32) -> (i32, i32) {
    %c0_i32 = arith.constant 0 : i32
    %c0_i32_0 = arith.constant 0 : i32
    %c0_i32_1 = arith.constant 0 : i32
    return %c0_i32, %c0_i32_0 : i32, i32
  }
  func.func @transform_4(%arg0: i32) -> (i32, i32) {
    %c0_i32 = arith.constant 0 : i32
    %c0_i32_0 = arith.constant 0 : i32
    return %arg0, %c0_i32 : i32, i32
  }
}

</mosaic_0001>

<bundles_post_ra>
// kernel: tpu_custom_call.1
= control target key start
LH: loop header
LB: loop body
LE: loop exit
PB: predicated region body
PF: predicated region fallthrough
CT: control target
= control target key end

     0   :  { %9 = vsyncpa [#allocation3], 0  ;;  %s2113_s0 = inlined_call_operand.hbm [shape: f32[8,1024], index: 0, kind: input, shape index: {}]   ;;  %s2114_s1 = inlined_call_operand.hbm [shape: f32[8,1024], index: 1, kind: input, shape index: {}]   ;;  %s2115_s2 = inlined_call_operand.hbm [shape: bf16[1024,128], index: 2, kind: input, shape index: {}]   ;;  %s2116_s3 = inlined_call_operand.hbm [shape: bf16[1024,128], index: 3, kind: input, shape index: {}]   ;;  %s2117_s4 = inlined_call_operand.hbm [shape: f32[8,128], index: 4, kind: output, shape index: {}]  }
   0x1   :  { %10 = vsyncpa [#allocation6], 0 }
   0x2   :  { %11 = vsyncpa [#allocation9], 0 }
   0x3   :  { %12 = vsyncpa [#allocation4], 0  ;;  %s2021_s15 = smov [#allocation5]   ;;  %s2022_s17 = smov [#allocation2]  }
   0x4   :  { %s29_s16 = sshll.u32 %s2021_s15, 4  ;;  %s19_s18 = sshll.u32 %s2022_s17, 4  ;;  %s30_s16 = int_to_ptr.vmem [resolvable:$true] %s29_s16  ;;  %s20_s18 = int_to_ptr.vmem [resolvable:$true] %s19_s18 }
   0x5   :  { %s1903_s21 = scalar_lea.hbm %s2114_s1, 1024 }
   0x6   :  { %p1904_p0 = scmp.ne.s32.totalorder %s2114_s1, %s1903_s21  ;;  %p1907_p1 = scmp.lt.u32.totalorder %s1903_s21, %s2114_s1 }
   0x8   :  { %p1909_p2 = pnand %p1907_p1, %p1904_p0 }
   0xa   :  { %1912 = shalt.err (!%p1909_p2)
}
   0xb   :  { %s1913_s26 = scalar_lea.vmem %s30_s16, 1024  ;;  %p1918_p4 = scmp.lt.s32.totalorder %s30_s16, %s30_s16 }
   0xc   :  { %p1914_p3 = scmp.ne.s32.totalorder %s30_s16, %s1913_s26  ;;  %p1919_p5 = scmp.lt.s32.totalorder %s1913_s26, %s1913_s26 }
   0xe   :  { %p1920_p6 = por %p1919_p5, %p1918_p4 }
  0x10   :  { %p1921_p7 = pnand %p1920_p6, %p1914_p3 }
  0x12   :  { %1924 = shalt.err (!%p1921_p7)
}
  0x13   :  { %32 = dma.hbm_to_vmem [thread:$0]  %s2114_s1, 1024, %s30_s16, [#allocation6]  }
  0x14   :  { %s1925_s5 = scalar_lea.hbm %s2113_s0, 1024 }
  0x15   :  { %p1926_p8 = scmp.ne.s32.totalorder %s2113_s0, %s1925_s5  ;;  %p1929_p9 = scmp.lt.u32.totalorder %s1925_s5, %s2113_s0 }
  0x17   :  { %p1931_p10 = pnand %p1929_p9, %p1926_p8 }
  0x19   :  { %1934 = shalt.err (!%p1931_p10)
}
  0x1a   :  { %s1935_s10 = scalar_lea.vmem %s20_s18, 1024  ;;  %p1940_p12 = scmp.lt.s32.totalorder %s20_s18, %s20_s18 }
  0x1b   :  { %p1936_p11 = scmp.ne.s32.totalorder %s20_s18, %s1935_s10  ;;  %p1941_p13 = scmp.lt.s32.totalorder %s1935_s10, %s1935_s10 }
  0x1d   :  { %p1942_p0 = por %p1941_p13, %p1940_p12 }
  0x1f   :  { %p1943_p1 = pnand %p1942_p0, %p1936_p11 }
  0x21   :  { %1946 = shalt.err (!%p1943_p1)
}
  0x22   :  { %22 = dma.hbm_to_vmem [thread:$0]  %s2113_s0, 1024, %s20_s18, [#allocation3]  }
  0x23   :  { %s2023_s12 = smov [#allocation7]   ;;  %s1947_s16 = scalar_lea.hbm %s2115_s2, 8192 }
  0x24   :  { %s38_s13 = sshll.u32 %s2023_s12, 4  ;;  %p1948_p2 = scmp.ne.s32.totalorder %s2115_s2, %s1947_s16  ;;  %s39_s13 = int_to_ptr.vmem [resolvable:$true] %s38_s13 }
  0x25   :  { %p1951_p3 = scmp.lt.u32.totalorder %s1947_s16, %s2115_s2 }
  0x27   :  { %p1953_p4 = pnand %p1951_p3, %p1948_p2 }
  0x29   :  { %1956 = shalt.err (!%p1953_p4)
}
  0x2a   :  { %s1957_s22 = scalar_lea.vmem %s39_s13, 8192  ;;  %p1962_p6 = scmp.lt.s32.totalorder %s39_s13, %s39_s13 }
  0x2b   :  { %p1958_p5 = scmp.ne.s32.totalorder %s39_s13, %s1957_s22  ;;  %p1963_p7 = scmp.lt.s32.totalorder %s1957_s22, %s1957_s22 }
  0x2d   :  { %p1964_p8 = por %p1963_p7, %p1962_p6 }
  0x2f   :  { %p1965_p9 = pnand %p1964_p8, %p1958_p5 }
  0x31   :  { %1968 = shalt.err (!%p1965_p9)
}
  0x32   :  { %s2024_s0 = smov 64   ;;  %s2025_s18 = smov 4  }
  0x33   :  { %44 = dma.hbm_to_vmem [thread:$0]  %s2115_s2, 8192, %s39_s13, [#allocation6], %s2024_s0, %s2024_s0, %s2025_s18  }
  0x34   :  { %s2026_s25 = smov [#allocation8]   ;;  %s1969_s29 = scalar_lea.hbm %s2116_s3, 8192 }
  0x35   :  { %s50_s26 = sshll.u32 %s2026_s25, 4  ;;  %p1970_p10 = scmp.ne.s32.totalorder %s2116_s3, %s1969_s29  ;;  %s51_s26 = int_to_ptr.vmem [resolvable:$true] %s50_s26 }
  0x36   :  { %p1973_p11 = scmp.lt.u32.totalorder %s1969_s29, %s2116_s3 }
  0x38   :  { %p1975_p12 = pnand %p1973_p11, %p1970_p10 }
  0x3a   :  { %1978 = shalt.err (!%p1975_p12)
}
  0x3b   :  { %s1979_s8 = scalar_lea.vmem %s51_s26, 8192  ;;  %p1984_p0 = scmp.lt.s32.totalorder %s51_s26, %s51_s26 }
  0x3c   :  { %p1980_p13 = scmp.ne.s32.totalorder %s51_s26, %s1979_s8  ;;  %p1985_p1 = scmp.lt.s32.totalorder %s1979_s8, %s1979_s8 }
  0x3e   :  { %p1986_p2 = por %p1985_p1, %p1984_p0 }
  0x40   :  { %p1987_p3 = pnand %p1986_p2, %p1980_p13 }
  0x42   :  { %1990 = shalt.err (!%p1987_p3)
}
  0x43   :  { %56 = dma.hbm_to_vmem [thread:$0]  %s2116_s3, 8192, %s51_s26, [#allocation9], %s2024_s0, %s2024_s0, %s2025_s18  }
  0x44   :  { %2013 = dma.done.wait [#allocation3], 1024  }
  0x45   :  { %2014 = vsyncadd [#allocation3], 4294966272 }
  0x46   :  { %2015 = dma.done.wait [#allocation6], 9216  }
  0x47   :  { %2016 = vsyncadd [#allocation6], 4294958080 }
  0x48   :  { %2017 = dma.done.wait [#allocation9], 8192  }
  0x49   :  { %2018 = vsyncadd [#allocation9], 4294959104  ;;  %v1775_v0 = vld [vmem:[#allocation8 + $0x40] sm:$0xff]   ;;  %v1779_v4 = vld [vmem:[#allocation8 + $0x48] sm:$0xff]   ;;  %s2027_s3 = smov [#allocation10]  }
  0x4a   :  { %v1776_v1 = vld [vmem:[#allocation8 + $0xc0] sm:$0xff]   ;;  %1592 = vmatprep.subr.bf16.mxu0 %v1775_v0  ;;  %v1780_v5 = vld [vmem:[#allocation8 + $0xc8] sm:$0xff]   ;;  %v1783_v8 = vld [vmem:[#allocation8 + $0x50] sm:$0xff]   ;;  %s1453_s10 = sshll.u32 %s2027_s3, 4  ;;  %s1454_s10 = int_to_ptr.vmem [resolvable:$true] %s1453_s10 }
  0x4b   :  { %v1777_v2 = vld [vmem:[#allocation8] sm:$0xff]   ;;  %1614 = vmatprep.subr.bf16.mxu1 %v1776_v1  ;;  %v1781_v6 = vld [vmem:[#allocation8 + $0x8] sm:$0xff]   ;;  %v1784_v9 = vld [vmem:[#allocation8 + $0xd0] sm:$0xff]   ;;  %s1991_s1 = scalar_lea.vmem %s1454_s10, 128  ;;  %p1996_p5 = scmp.lt.s32.totalorder %s1454_s10, %s1454_s10 }
  0x4c   :  { %v1778_v3 = vld [vmem:[#allocation8 + $0x80] sm:$0xff]   ;;  %1593 = vmatpush3.bf16.msra.mxu0 %v1777_v2  ;;  %v1782_v7 = vld [vmem:[#allocation8 + $0x88] sm:$0xff]   ;;  %v1785_v10 = vld [vmem:[#allocation8 + $0x10] sm:$0xff]   ;;  %p1992_p4 = scmp.ne.s32.totalorder %s1454_s10, %s1991_s1  ;;  %p1997_p6 = scmp.lt.s32.totalorder %s1991_s1, %s1991_s1 }
  0x4d   :  { %1615 = vmatpush3.bf16.msra.mxu1 %v1778_v3  ;;  %1594 = vmatprep.subr.bf16.mxu0 %v1779_v4  ;;  %v1786_v11 = vld [vmem:[#allocation8 + $0x90] sm:$0xff]   ;;  %v1787_v12 = vld [vmem:[#allocation8 + $0x58] sm:$0xff]   ;;  %v1791_v16 = vld [vmem:[#allocation8 + $0x60] sm:$0xff]  }
  0x4e   :  { %1616 = vmatprep.subr.bf16.mxu1 %v1780_v5  ;;  %v1788_v13 = vld [vmem:[#allocation8 + $0xd8] sm:$0xff]   ;;  %v1792_v17 = vld [vmem:[#allocation8 + $0xe0] sm:$0xff]   ;;  %v1795_v20 = vld [vmem:[#allocation8 + $0x68] sm:$0xff]   ;;  %p1998_p7 = por %p1997_p6, %p1996_p5 }
  0x4f   :  { %v1789_v14 = vld [vmem:[#allocation8 + $0x18] sm:$0xff]   ;;  %v1793_v18 = vld [vmem:[#allocation8 + $0x20] sm:$0xff]   ;;  %v1796_v21 = vld [vmem:[#allocation8 + $0xe8] sm:$0xff]  }
  0x50   :  { %1595 = vmatpush3.bf16.msra.mxu0 %v1781_v6  ;;  %v1790_v15 = vld [vmem:[#allocation8 + $0x98] sm:$0xff]   ;;  %v1794_v19 = vld [vmem:[#allocation8 + $0xa0] sm:$0xff]   ;;  %v1797_v22 = vld [vmem:[#allocation8 + $0x28] sm:$0xff]   ;;  %p1999_p8 = pnand %p1998_p7, %p1992_p4 }
  0x51   :  { %1617 = vmatpush3.bf16.msra.mxu1 %v1782_v7  ;;  %1596 = vmatprep.subr.bf16.mxu0 %v1783_v8  ;;  %v1798_v23 = vld [vmem:[#allocation8 + $0xa8] sm:$0xff]   ;;  %v1799_v24 = vld [vmem:[#allocation8 + $0x70] sm:$0xff]   ;;  %v1803_v28 = vld [vmem:[#allocation8 + $0x78] sm:$0xff]  }
  0x52   :  { %1618 = vmatprep.subr.bf16.mxu1 %v1784_v9  ;;  %v1800_v25 = vld [vmem:[#allocation8 + $0xf0] sm:$0xff]   ;;  %v1804_v29 = vld [vmem:[#allocation8 + $0xf8] sm:$0xff]   ;;  %v87_v32 = vld [vmem:[#allocation5 + $0x8] sm:$0xff] }
  0x53   :  { %v1801_v26 = vld [vmem:[#allocation8 + $0x30] sm:$0xff]   ;;  %v1805_v30 = vld [vmem:[#allocation8 + $0x38] sm:$0xff]   ;;  %v86_v34 = vld [vmem:[#allocation5] sm:$0xff]  ;;  %v95_v35 = vpack.c.bf16 %v87_v32, %v87_v32 }
  0x54   :  { %1597 = vmatpush3.bf16.msra.mxu0 %v1785_v10  ;;  %v1802_v27 = vld [vmem:[#allocation8 + $0xb0] sm:$0xff]   ;;  %v1806_v31 = vld [vmem:[#allocation8 + $0xb8] sm:$0xff]   ;;  %v94_v37 = vpack.c.bf16 %v86_v34, %v86_v34  ;;  %v1807_v40 = vld [vmem:[#allocation8 + $0x140] sm:$0xff]  }
  0x55   :  { %1619 = vmatpush3.bf16.msra.mxu1 %v1786_v11  ;;  %1598 = vmatprep.subr.bf16.mxu0 %v1787_v12  ;;  %v89_v33 = vld [vmem:[#allocation5 + $0x18] sm:$0xff]  ;;  %v88_v38 = vld [vmem:[#allocation5 + $0x10] sm:$0xff]  ;;  %v1808_v41 = vld [vmem:[#allocation8 + $0x1c0] sm:$0xff]  }
  0x56   :  { %1620 = vmatprep.subr.bf16.mxu1 %v1788_v13  ;;  %v97_v36 = vpack.c.bf16 %v89_v33, %v89_v33  ;;  %v96_v39 = vpack.c.bf16 %v88_v38, %v88_v38  ;;  %774 = vmatprep.mubr.bf16.mxu0 %v95_v35  ;;  %v1809_v42 = vld [vmem:[#allocation8 + $0x100] sm:$0xff]   ;;  %v1811_v44 = vld [vmem:[#allocation8 + $0x148] sm:$0xff]   ;;  %v1815_v48 = vld [vmem:[#allocation8 + $0x150] sm:$0xff]  }
  0x57   :  { %v1810_v43 = vld [vmem:[#allocation8 + $0x180] sm:$0xff]   ;;  %v1812_v45 = vld [vmem:[#allocation8 + $0x1c8] sm:$0xff]   ;;  %v1816_v49 = vld [vmem:[#allocation8 + $0x1d0] sm:$0xff]  }
  0x58   :  { %1599 = vmatpush3.bf16.msra.mxu0 %v1789_v14  ;;  %814 = vmatprep.mubr.bf16.mxu1 %v97_v36  ;;  %v1813_v46 = vld [vmem:[#allocation8 + $0x108] sm:$0xff]   ;;  %v1817_v50 = vld [vmem:[#allocation8 + $0x110] sm:$0xff]   ;;  %v1819_v52 = vld [vmem:[#allocation8 + $0x158] sm:$0xff]  }
  0x59   :  { %1621 = vmatpush3.bf16.msra.mxu1 %v1790_v15  ;;  %1600 = vmatprep.subr.bf16.mxu0 %v1791_v16  ;;  %v1814_v47 = vld [vmem:[#allocation8 + $0x188] sm:$0xff]   ;;  %v1818_v51 = vld [vmem:[#allocation8 + $0x190] sm:$0xff]   ;;  %v1820_v53 = vld [vmem:[#allocation8 + $0x1d8] sm:$0xff]  }
  0x5a   :  { %1622 = vmatprep.subr.bf16.mxu1 %v1792_v17  ;;  %v1821_v54 = vld [vmem:[#allocation8 + $0x118] sm:$0xff]   ;;  %v1823_v56 = vld [vmem:[#allocation8 + $0x160] sm:$0xff]   ;;  %v1827_v60 = vld [vmem:[#allocation8 + $0x168] sm:$0xff]  }
  0x5b   :  { %v1822_v55 = vld [vmem:[#allocation8 + $0x198] sm:$0xff]   ;;  %v1824_v57 = vld [vmem:[#allocation8 + $0x1e0] sm:$0xff]   ;;  %v1828_v61 = vld [vmem:[#allocation8 + $0x1e8] sm:$0xff]  }
  0x5c   :  { %1601 = vmatpush3.bf16.msra.mxu0 %v1793_v18  ;;  %v1825_v58 = vld [vmem:[#allocation8 + $0x120] sm:$0xff]   ;;  %v1829_v62 = vld [vmem:[#allocation8 + $0x128] sm:$0xff]   ;;  %v1831_v0 = vld [vmem:[#allocation8 + $0x170] sm:$0xff]  }
  0x5d   :  { %1623 = vmatpush3.bf16.msra.mxu1 %v1794_v19  ;;  %1602 = vmatprep.subr.bf16.mxu0 %v1795_v20  ;;  %v1826_v59 = vld [vmem:[#allocation8 + $0x1a0] sm:$0xff]   ;;  %v1830_v63 = vld [vmem:[#allocation8 + $0x1a8] sm:$0xff]   ;;  %v1832_v1 = vld [vmem:[#allocation8 + $0x1f0] sm:$0xff]  }
  0x5e   :  { %1624 = vmatprep.subr.bf16.mxu1 %v1796_v21  ;;  %v1833_v2 = vld [vmem:[#allocation8 + $0x130] sm:$0xff]   ;;  %v1835_v4 = vld [vmem:[#allocation8 + $0x178] sm:$0xff]   ;;  %v91_v8 = vld [vmem:[#allocation5 + $0x28] sm:$0xff] }
  0x5f   :  { %v1834_v3 = vld [vmem:[#allocation8 + $0x1b0] sm:$0xff]   ;;  %v1836_v5 = vld [vmem:[#allocation8 + $0x1f8] sm:$0xff]   ;;  %v99_v10 = vpack.c.bf16 %v91_v8, %v91_v8  ;;  %v90_v12 = vld [vmem:[#allocation5 + $0x20] sm:$0xff] }
  0x60   :  { %1603 = vmatpush3.bf16.msra.mxu0 %v1797_v22  ;;  %v1837_v6 = vld [vmem:[#allocation8 + $0x138] sm:$0xff]   ;;  %v92_v13 = vld [vmem:[#allocation5 + $0x30] sm:$0xff]  ;;  %v98_v14 = vpack.c.bf16 %v90_v12, %v90_v12  ;;  %v1839_v16 = vld [vmem:[#allocation7 + $0x40] sm:$0xff]  }
  0x61   :  { %1625 = vmatpush3.bf16.msra.mxu1 %v1798_v23  ;;  %1604 = vmatprep.subr.bf16.mxu0 %v1799_v24  ;;  %v1838_v7 = vld [vmem:[#allocation8 + $0x1b8] sm:$0xff]   ;;  %v100_v15 = vpack.c.bf16 %v92_v13, %v92_v13  ;;  %v1840_v17 = vld [vmem:[#allocation7 + $0xc0] sm:$0xff]   ;;  %v1843_v20 = vld [vmem:[#allocation7 + $0x48] sm:$0xff]  }
  0x62   :  { %1626 = vmatprep.subr.bf16.mxu1 %v1800_v25  ;;  %v93_v9 = vld [vmem:[#allocation5 + $0x38] sm:$0xff]  ;;  %v1841_v18 = vld [vmem:[#allocation7] sm:$0xff]   ;;  %v1844_v21 = vld [vmem:[#allocation7 + $0xc8] sm:$0xff]  }
  0x63   :  { %v101_v11 = vpack.c.bf16 %v93_v9, %v93_v9  ;;  %v1842_v19 = vld [vmem:[#allocation7 + $0x80] sm:$0xff]   ;;  %v1845_v22 = vld [vmem:[#allocation7 + $0x8] sm:$0xff]   ;;  %v1847_v24 = vld [vmem:[#allocation7 + $0x50] sm:$0xff]  }
  0x64   :  { %1605 = vmatpush3.bf16.msra.mxu0 %v1801_v26  ;;  %v1846_v23 = vld [vmem:[#allocation7 + $0x88] sm:$0xff]   ;;  %v1848_v25 = vld [vmem:[#allocation7 + $0xd0] sm:$0xff]   ;;  %v1855_v32 = vld [vmem:[#allocation7 + $0x60] sm:$0xff]  }
  0x65   :  { %1627 = vmatpush3.bf16.msra.mxu1 %v1802_v27  ;;  %1606 = vmatprep.subr.bf16.mxu0 %v1803_v28  ;;  %v1849_v26 = vld [vmem:[#allocation7 + $0x10] sm:$0xff]   ;;  %v1851_v28 = vld [vmem:[#allocation7 + $0x58] sm:$0xff]   ;;  %v1856_v33 = vld [vmem:[#allocation7 + $0xe0] sm:$0xff]  }
  0x66   :  { %1628 = vmatprep.subr.bf16.mxu1 %v1804_v29  ;;  %v1850_v27 = vld [vmem:[#allocation7 + $0x90] sm:$0xff]   ;;  %v1852_v29 = vld [vmem:[#allocation7 + $0xd8] sm:$0xff]   ;;  %v1857_v34 = vld [vmem:[#allocation7 + $0x20] sm:$0xff]  }
  0x67   :  { %v1858_v35 = vld [vmem:[#allocation7 + $0xa0] sm:$0xff]   ;;  %v1859_v36 = vld [vmem:[#allocation7 + $0x68] sm:$0xff]  }
  0x68   :  { %1607 = vmatpush3.bf16.msra.mxu0 %v1805_v30  ;;  %v1853_v30 = vld [vmem:[#allocation7 + $0x18] sm:$0xff]   ;;  %v1861_v38 = vld [vmem:[#allocation7 + $0x28] sm:$0xff]   ;;  %v1887_v8 = vld [vmem:[#allocation7 + $0x160] sm:$0xff]  }
  0x69   :  { %1629 = vmatpush3.bf16.msra.mxu1 %v1806_v31  ;;  %1636 = vmatprep.subr.bf16.mxu0 %v1807_v40  ;;  %v1854_v31 = vld [vmem:[#allocation7 + $0x98] sm:$0xff]   ;;  %v1863_v40 = vld [vmem:[#allocation7 + $0x70] sm:$0xff]   ;;  %v1888_v9 = vld [vmem:[#allocation7 + $0x1e0] sm:$0xff]  }
  0x6a   :  { %1658 = vmatprep.subr.bf16.mxu1 %v1808_v41  ;;  %v1864_v41 = vld [vmem:[#allocation7 + $0xf0] sm:$0xff]   ;;  %v1891_v12 = vld [vmem:[#allocation7 + $0x168] sm:$0xff]  }
  0x6b   :  { %775 = vmatmul.mubr.bf16.vlgmr.msra.gmra.mrb[0].mxu0 %v94_v37  ;;  %v1860_v37 = vld [vmem:[#allocation7 + $0xe8] sm:$0xff]  }
  0x6c   :  { %815 = vmatmul.mubr.bf16.vlgmr.msra.gmra.mrb[0].mxu1 %v96_v39  ;;  %1637 = vmatpush3.bf16.msra.mxu0 %v1809_v42  ;;  %v1862_v39 = vld [vmem:[#allocation7 + $0xa8] sm:$0xff]   ;;  %v1865_v42 = vld [vmem:[#allocation7 + $0x30] sm:$0xff]  }
  0x6d   :  { %1659 = vmatpush3.bf16.msra.mxu1 %v1810_v43  ;;  %1638 = vmatprep.subr.bf16.mxu0 %v1811_v44  ;;  %v1866_v43 = vld [vmem:[#allocation7 + $0xb0] sm:$0xff]   ;;  %v1867_v44 = vld [vmem:[#allocation7 + $0x78] sm:$0xff]   ;;  %v1892_v13 = vld [vmem:[#allocation7 + $0x1e8] sm:$0xff]  }
  0x6e   :  { %1660 = vmatprep.subr.bf16.mxu1 %v1812_v45  ;;  %854 = vmatprep.mubr.bf16.mxu0 %v99_v10  ;;  %v1868_v45 = vld [vmem:[#allocation7 + $0xf8] sm:$0xff]   ;;  %v1889_v10 = vld [vmem:[#allocation7 + $0x120] sm:$0xff]  }
  0x6f   :  { %894 = vmatprep.mubr.bf16.mxu1 %v101_v11  ;;  %v1890_v11 = vld [vmem:[#allocation7 + $0x1a0] sm:$0xff]  }
  0x70   :  { %1639 = vmatpush3.bf16.msra.mxu0 %v1813_v46  ;;  %v1869_v46 = vld [vmem:[#allocation7 + $0x38] sm:$0xff]  }
  0x71   :  { %1661 = vmatpush3.bf16.msra.mxu1 %v1814_v47  ;;  %1640 = vmatprep.subr.bf16.mxu0 %v1815_v48  ;;  %v1870_v47 = vld [vmem:[#allocation7 + $0xb8] sm:$0xff]   ;;  %v71_v48 = vld [vmem:[#allocation2 + $0x8] sm:$0xff] }
  0x72   :  { %1662 = vmatprep.subr.bf16.mxu1 %v1816_v49  ;;  %v79_v49 = vpack.c.bf16 %v71_v48, %v71_v48 }
  0x74   :  { %1641 = vmatpush3.bf16.msra.mxu0 %v1817_v50  ;;  %v73_v50 = vld [vmem:[#allocation2 + $0x18] sm:$0xff] }
  0x75   :  { %1663 = vmatpush3.bf16.msra.mxu1 %v1818_v51  ;;  %1642 = vmatprep.subr.bf16.mxu0 %v1819_v52  ;;  %v70_v51 = vld [vmem:[#allocation2] sm:$0xff]  ;;  %v72_v52 = vld [vmem:[#allocation2 + $0x10] sm:$0xff] }
  0x76   :  { %1664 = vmatprep.subr.bf16.mxu1 %v1820_v53  ;;  %v81_v53 = vpack.c.bf16 %v73_v50, %v73_v50 }
  0x78   :  { %1643 = vmatpush3.bf16.msra.mxu0 %v1821_v54  ;;  %v78_v54 = vpack.c.bf16 %v70_v51, %v70_v51 }
  0x79   :  { %1665 = vmatpush3.bf16.msra.mxu1 %v1822_v55  ;;  %1644 = vmatprep.subr.bf16.mxu0 %v1823_v56  ;;  %v80_v55 = vpack.c.bf16 %v72_v52, %v72_v52  ;;  %v1871_v56 = vld [vmem:[#allocation7 + $0x140] sm:$0xff]  }
  0x7a   :  { %1666 = vmatprep.subr.bf16.mxu1 %v1824_v57  ;;  %v1872_v57 = vld [vmem:[#allocation7 + $0x1c0] sm:$0xff]  }
  0x7c   :  { %1645 = vmatpush3.bf16.msra.mxu0 %v1825_v58  ;;  %v1873_v58 = vld [vmem:[#allocation7 + $0x100] sm:$0xff]  }
  0x7d   :  { %1667 = vmatpush3.bf16.msra.mxu1 %v1826_v59  ;;  %1646 = vmatprep.subr.bf16.mxu0 %v1827_v60  ;;  %v1874_v59 = vld [vmem:[#allocation7 + $0x180] sm:$0xff]   ;;  %v1875_v60 = vld [vmem:[#allocation7 + $0x148] sm:$0xff]  }
  0x7e   :  { %1668 = vmatprep.subr.bf16.mxu1 %v1828_v61  ;;  %v1876_v61 = vld [vmem:[#allocation7 + $0x1c8] sm:$0xff]  }
  0x80   :  { %1647 = vmatpush3.bf16.msra.mxu0 %v1829_v62  ;;  %v1877_v62 = vld [vmem:[#allocation7 + $0x108] sm:$0xff]  }
  0x81   :  { %1669 = vmatpush3.bf16.msra.mxu1 %v1830_v63  ;;  %1648 = vmatprep.subr.bf16.mxu0 %v1831_v0  ;;  %v1878_v63 = vld [vmem:[#allocation7 + $0x188] sm:$0xff]   ;;  %v1879_v0 = vld [vmem:[#allocation7 + $0x150] sm:$0xff]  }
  0x82   :  { %1670 = vmatprep.subr.bf16.mxu1 %v1832_v1  ;;  %v1880_v1 = vld [vmem:[#allocation7 + $0x1d0] sm:$0xff]  }
  0x84   :  { %1649 = vmatpush3.bf16.msra.mxu0 %v1833_v2  ;;  %v1881_v2 = vld [vmem:[#allocation7 + $0x110] sm:$0xff]  }
  0x85   :  { %1671 = vmatpush3.bf16.msra.mxu1 %v1834_v3  ;;  %1650 = vmatprep.subr.bf16.mxu0 %v1835_v4  ;;  %v1882_v3 = vld [vmem:[#allocation7 + $0x190] sm:$0xff]   ;;  %v1883_v4 = vld [vmem:[#allocation7 + $0x158] sm:$0xff]  }
  0x86   :  { %1672 = vmatprep.subr.bf16.mxu1 %v1836_v5  ;;  %v1884_v5 = vld [vmem:[#allocation7 + $0x1d8] sm:$0xff]  }
  0x88   :  { %1651 = vmatpush3.bf16.msra.mxu0 %v1837_v6  ;;  %v1885_v6 = vld [vmem:[#allocation7 + $0x118] sm:$0xff]  }
  0x89   :  { %1673 = vmatpush3.bf16.msra.mxu1 %v1838_v7  ;;  %1680 = vmatprep.subr.bf16.mxu0 %v1839_v16  ;;  %v1886_v7 = vld [vmem:[#allocation7 + $0x198] sm:$0xff]   ;;  %v1895_v16 = vld [vmem:[#allocation7 + $0x170] sm:$0xff]  }
  0x8a   :  { %1702 = vmatprep.subr.bf16.mxu1 %v1840_v17  ;;  %v1896_v17 = vld [vmem:[#allocation7 + $0x1f0] sm:$0xff]  }
  0x8b   :  { %855 = vmatmul.mubr.bf16.vlgmr.msra.gmra.mrb[4].mxu0 %v98_v14  ;;  %v1893_v14 = vld [vmem:[#allocation7 + $0x128] sm:$0xff]  }
  0x8c   :  { %895 = vmatmul.mubr.bf16.vlgmr.msra.gmra.mrb[4].mxu1 %v100_v15  ;;  %1681 = vmatpush3.bf16.msra.mxu0 %v1841_v18  ;;  %v1894_v15 = vld [vmem:[#allocation7 + $0x1a8] sm:$0xff]   ;;  %v1897_v18 = vld [vmem:[#allocation7 + $0x130] sm:$0xff]  }
  0x8d   :  { %1703 = vmatpush3.bf16.msra.mxu1 %v1842_v19  ;;  %1682 = vmatprep.subr.bf16.mxu0 %v1843_v20  ;;  %v1898_v19 = vld [vmem:[#allocation7 + $0x1b0] sm:$0xff]   ;;  %v1899_v20 = vld [vmem:[#allocation7 + $0x178] sm:$0xff]  }
  0x8e   :  { %1704 = vmatprep.subr.bf16.mxu1 %v1844_v21  ;;  %1318 = vmatprep.mubr.bf16.mxu0 %v79_v49  ;;  %v1900_v21 = vld [vmem:[#allocation7 + $0x1f8] sm:$0xff]  }
  0x8f   :  { %1358 = vmatprep.mubr.bf16.mxu1 %v81_v53 }
  0x90   :  { %1683 = vmatpush3.bf16.msra.mxu0 %v1845_v22  ;;  %v1901_v22 = vld [vmem:[#allocation7 + $0x138] sm:$0xff]  }
  0x91   :  { %1705 = vmatpush3.bf16.msra.mxu1 %v1846_v23  ;;  %1684 = vmatprep.subr.bf16.mxu0 %v1847_v24  ;;  %v1902_v23 = vld [vmem:[#allocation7 + $0x1b8] sm:$0xff]   ;;  %v75_v24 = vld [vmem:[#allocation2 + $0x28] sm:$0xff] }
  0x92   :  { %1706 = vmatprep.subr.bf16.mxu1 %v1848_v25  ;;  %v77_v25 = vld [vmem:[#allocation2 + $0x38] sm:$0xff] }
  0x94   :  { %1685 = vmatpush3.bf16.msra.mxu0 %v1849_v26  ;;  %v74_v26 = vld [vmem:[#allocation2 + $0x20] sm:$0xff] }
  0x95   :  { %1707 = vmatpush3.bf16.msra.mxu1 %v1850_v27  ;;  %1686 = vmatprep.subr.bf16.mxu0 %v1851_v28  ;;  %v83_v27 = vpack.c.bf16 %v75_v24, %v75_v24  ;;  %v85_v28 = vpack.c.bf16 %v77_v25, %v77_v25 }
  0x96   :  { %1708 = vmatprep.subr.bf16.mxu1 %v1852_v29  ;;  %v82_v29 = vpack.c.bf16 %v74_v26, %v74_v26 }
  0x98   :  { %1687 = vmatpush3.bf16.msra.mxu0 %v1853_v30  ;;  %v76_v30 = vld [vmem:[#allocation2 + $0x30] sm:$0xff] }
  0x99   :  { %1709 = vmatpush3.bf16.msra.mxu1 %v1854_v31  ;;  %1688 = vmatprep.subr.bf16.mxu0 %v1855_v32  ;;  %v84_v31 = vpack.c.bf16 %v76_v30, %v76_v30 }
  0x9a   :  { %1710 = vmatprep.subr.bf16.mxu1 %v1856_v33 }
  0x9c   :  { %1689 = vmatpush3.bf16.msra.mxu0 %v1857_v34 }
  0x9d   :  { %1711 = vmatpush3.bf16.msra.mxu1 %v1858_v35  ;;  %1690 = vmatprep.subr.bf16.mxu0 %v1859_v36 }
  0x9e   :  { %1712 = vmatprep.subr.bf16.mxu1 %v1860_v37 }
  0xa0   :  { %1691 = vmatpush3.bf16.msra.mxu0 %v1861_v38 }
  0xa1   :  { %1713 = vmatpush3.bf16.msra.mxu1 %v1862_v39  ;;  %1692 = vmatprep.subr.bf16.mxu0 %v1863_v40 }
  0xa2   :  { %1714 = vmatprep.subr.bf16.mxu1 %v1864_v41 }
  0xa4   :  { %1693 = vmatpush3.bf16.msra.mxu0 %v1865_v42 }
  0xa5   :  { %1715 = vmatpush3.bf16.msra.mxu1 %v1866_v43  ;;  %1694 = vmatprep.subr.bf16.mxu0 %v1867_v44 }
  0xa6   :  { %1716 = vmatprep.subr.bf16.mxu1 %v1868_v45 }
  0xa8   :  { %1695 = vmatpush3.bf16.msra.mxu0 %v1869_v46 }
  0xa9   :  { %1717 = vmatpush3.bf16.msra.mxu1 %v1870_v47  ;;  %1724 = vmatprep.subr.bf16.mxu0 %v1871_v56 }
  0xaa   :  { %1746 = vmatprep.subr.bf16.mxu1 %v1872_v57 }
  0xab   :  { %1319 = vmatmul.mubr.bf16.vlgmr.msra.gmra.mrb[8].mxu0 %v78_v54 }
  0xac   :  { %1359 = vmatmul.mubr.bf16.vlgmr.msra.gmra.mrb[8].mxu1 %v80_v55  ;;  %1725 = vmatpush3.bf16.msra.mxu0 %v1873_v58 }
  0xad   :  { %1747 = vmatpush3.bf16.msra.mxu1 %v1874_v59  ;;  %1726 = vmatprep.subr.bf16.mxu0 %v1875_v60 }
  0xae   :  { %1748 = vmatprep.subr.bf16.mxu1 %v1876_v61  ;;  %1398 = vmatprep.mubr.bf16.mxu0 %v83_v27 }
  0xaf   :  { %1438 = vmatprep.mubr.bf16.mxu1 %v85_v28 }
  0xb0   :  { %1727 = vmatpush3.bf16.msra.mxu0 %v1877_v62 }
  0xb1   :  { %1749 = vmatpush3.bf16.msra.mxu1 %v1878_v63  ;;  %1728 = vmatprep.subr.bf16.mxu0 %v1879_v0 }
  0xb2   :  { %1750 = vmatprep.subr.bf16.mxu1 %v1880_v1 }
  0xb4   :  { %1729 = vmatpush3.bf16.msra.mxu0 %v1881_v2 }
  0xb5   :  { %1751 = vmatpush3.bf16.msra.mxu1 %v1882_v3  ;;  %1730 = vmatprep.subr.bf16.mxu0 %v1883_v4 }
  0xb6   :  { %1752 = vmatprep.subr.bf16.mxu1 %v1884_v5 }
  0xb8   :  { %1731 = vmatpush3.bf16.msra.mxu0 %v1885_v6 }
  0xb9   :  { %1753 = vmatpush3.bf16.msra.mxu1 %v1886_v7  ;;  %1732 = vmatprep.subr.bf16.mxu0 %v1887_v8 }
  0xba   :  { %1754 = vmatprep.subr.bf16.mxu1 %v1888_v9 }
  0xbc   :  { %1733 = vmatpush3.bf16.msra.mxu0 %v1889_v10 }
  0xbd   :  { %1755 = vmatpush3.bf16.msra.mxu1 %v1890_v11  ;;  %1734 = vmatprep.subr.bf16.mxu0 %v1891_v12 }
  0xbe   :  { %1756 = vmatprep.subr.bf16.mxu1 %v1892_v13 }
  0xc0   :  { %1735 = vmatpush3.bf16.msra.mxu0 %v1893_v14 }
  0xc1   :  { %1757 = vmatpush3.bf16.msra.mxu1 %v1894_v15  ;;  %1736 = vmatprep.subr.bf16.mxu0 %v1895_v16 }
  0xc2   :  { %1758 = vmatprep.subr.bf16.mxu1 %v1896_v17 }
  0xc4   :  { %1737 = vmatpush3.bf16.msra.mxu0 %v1897_v18 }
  0xc5   :  { %1759 = vmatpush3.bf16.msra.mxu1 %v1898_v19  ;;  %1738 = vmatprep.subr.bf16.mxu0 %v1899_v20 }
  0xc6   :  { %1760 = vmatprep.subr.bf16.mxu1 %v1900_v21 }
  0xc8   :  { %1739 = vmatpush3.bf16.msra.mxu0 %v1901_v22 }
  0xc9   :  { %1761 = vmatpush3.bf16.msra.mxu1 %v1902_v23 }
  0xcb   :  { %1399 = vmatmul.mubr.bf16.vlgmr.msra.gmra.mrb[12].mxu0 %v82_v29 }
  0xcc   :  { %1439 = vmatmul.mubr.bf16.vlgmr.msra.gmra.mrb[12].mxu1 %v84_v31 }
 0x13e   :  { %v1608_v32 = vpop.f32.mrb[0].mxu0 }
 0x13f   :  { %v1630_v33 = vpop.f32.mrb[0].mxu1  ;;  %v1609_v34 = vpop.f32.mrb[1].mxu0 }
 0x140   :  { %v1631_v35 = vpop.f32.mrb[1].mxu1  ;;  %v1610_v36 = vadd.f32 %v1609_v34, %v1608_v32  ;;  %v1611_v38 = vpop.f32.mrb[2].mxu0 }
 0x141   :  { %v1632_v37 = vadd.f32 %v1631_v35, %v1630_v33  ;;  %v1633_v39 = vpop.f32.mrb[2].mxu1  ;;  %v1612_v40 = vpop.f32.mrb[3].mxu0 }
 0x142   :  { %v1634_v41 = vpop.f32.mrb[3].mxu1 }
 0x143   :  { %v817_v42 = vadd.f32 %v1632_v37, %v1610_v36 }
 0x15e   :  { %v1652_v43 = vpop.f32.mrb[4].mxu0 }
 0x15f   :  { %v1674_v44 = vpop.f32.mrb[4].mxu1  ;;  %v1653_v45 = vpop.f32.mrb[5].mxu0 }
 0x160   :  { %v1654_v46 = vadd.f32 %v1653_v45, %v1652_v43  ;;  %v1675_v47 = vpop.f32.mrb[5].mxu1  ;;  %v1655_v48 = vpop.f32.mrb[6].mxu0 }
 0x161   :  { %v1676_v49 = vadd.f32 %v1675_v47, %v1674_v44  ;;  %v1677_v50 = vpop.f32.mrb[6].mxu1  ;;  %v1656_v51 = vpop.f32.mrb[7].mxu0 }
 0x162   :  { %v857_v52 = vadd.f32 %v1654_v46, %v817_v42  ;;  %v1678_v53 = vpop.f32.mrb[7].mxu1 }
 0x164   :  { %v897_v54 = vadd.f32 %v1676_v49, %v857_v52 }
 0x17e   :  { %v1696_v55 = vpop.f32.mrb[8].mxu0 }
 0x17f   :  { %v1718_v56 = vpop.f32.mrb[8].mxu1  ;;  %v1697_v57 = vpop.f32.mrb[9].mxu0 }
 0x180   :  { %v1698_v58 = vadd.f32 %v1697_v57, %v1696_v55  ;;  %v1719_v59 = vpop.f32.mrb[9].mxu1  ;;  %v1699_v60 = vpop.f32.mrb[10].mxu0 }
 0x181   :  { %v1720_v61 = vadd.f32 %v1719_v59, %v1718_v56  ;;  %v1721_v62 = vpop.f32.mrb[10].mxu1  ;;  %v1700_v63 = vpop.f32.mrb[11].mxu0 }
 0x182   :  { %v1321_v0 = vadd.f32 %v1698_v58, %v897_v54  ;;  %v1722_v1 = vpop.f32.mrb[11].mxu1 }
 0x184   :  { %v1361_v2 = vadd.f32 %v1720_v61, %v1321_v0 }
 0x19e   :  { %v1740_v3 = vpop.f32.mrb[12].mxu0 }
 0x19f   :  { %v1762_v4 = vpop.f32.mrb[12].mxu1  ;;  %v1741_v5 = vpop.f32.mrb[13].mxu0 }
 0x1a0   :  { %v1763_v6 = vpop.f32.mrb[13].mxu1  ;;  %v1742_v7 = vadd.f32 %v1741_v5, %v1740_v3  ;;  %v1743_v9 = vpop.f32.mrb[14].mxu0 }
 0x1a1   :  { %v1764_v8 = vadd.f32 %v1763_v6, %v1762_v4  ;;  %v1765_v10 = vpop.f32.mrb[14].mxu1  ;;  %v1744_v11 = vpop.f32.mrb[15].mxu0 }
 0x1a2   :  { %v1766_v12 = vpop.f32.mrb[15].mxu1  ;;  %v1401_v13 = vadd.f32 %v1742_v7, %v1361_v2 }
 0x1a4   :  { %v1441_v14 = vadd.f32 %v1764_v8, %v1401_v13 }
 0x1a6   :  { %1446 = vst [vmem:[#allocation10] sm:$0xff] %v1441_v14 }
 0x1a7   :  { %2002 = shalt.err (!%p1999_p8)
}
 0x1a8   :  { %s2003_s13 = scalar_lea.hbm %s2117_s4, 128 }
 0x1a9   :  { %p2004_p9 = scmp.ne.s32.totalorder %s2117_s4, %s2003_s13  ;;  %p2007_p10 = scmp.lt.u32.totalorder %s2003_s13, %s2117_s4 }
 0x1ab   :  { %p2009_p11 = pnand %p2007_p10, %p2004_p9 }
 0x1ad   :  { %2012 = shalt.err (!%p2009_p11)
}
 0x1ae   :  { %1456 = dma.vmem_to_hbm [thread:$0]  %s1454_s10, 128, %s2117_s4, [#allocation4]  }
 0x1af   :  { %2019 = dma.done.wait [#allocation4], 128  }
 0x1b0   :  { %2020 = vsyncadd [#allocation4], 4294967168 }
 0x1b1   :  { %1460 = vsyncpa [#allocation3], 1 }
 0x1b2   :  { %1461 = vsyncpa [#allocation6], 1 }
 0x1b3   :  { %1462 = vsyncpa [#allocation9], 1 }
 0x1b4   :  { %1463 = vsyncpa [#allocation4], 1 }

// kernel: tpu_custom_call.1
= control target key start
LH: loop header
LB: loop body
LE: loop exit
PB: predicated region body
PF: predicated region fallthrough
CT: control target
= control target key end

     0   :  { %9 = vsyncpa [#allocation3], 0  ;;  %s2113_s0 = inlined_call_operand.hbm [shape: f32[8,1024], index: 0, kind: input, shape index: {}]   ;;  %s2114_s1 = inlined_call_operand.hbm [shape: f32[8,1024], index: 1, kind: input, shape index: {}]   ;;  %s2115_s2 = inlined_call_operand.hbm [shape: bf16[1024,128], index: 2, kind: input, shape index: {}]   ;;  %s2116_s3 = inlined_call_operand.hbm [shape: bf16[1024,128], index: 3, kind: input, shape index: {}]   ;;  %s2117_s4 = inlined_call_operand.hbm [shape: f32[8,128], index: 4, kind: output, shape index: {}]  }
   0x1   :  { %10 = vsyncpa [#allocation6], 0 }
   0x2   :  { %11 = vsyncpa [#allocation9], 0 }
   0x3   :  { %12 = vsyncpa [#allocation4], 0  ;;  %s2021_s15 = smov [#allocation5]   ;;  %s2022_s17 = smov [#allocation2]  }
   0x4   :  { %s29_s16 = sshll.u32 %s2021_s15, 4  ;;  %s19_s18 = sshll.u32 %s2022_s17, 4  ;;  %s30_s16 = int_to_ptr.vmem [resolvable:$true] %s29_s16  ;;  %s20_s18 = int_to_ptr.vmem [resolvable:$true] %s19_s18 }
   0x5   :  { %s1903_s21 = scalar_lea.hbm %s2114_s1, 1024 }
   0x6   :  { %p1904_p0 = scmp.ne.s32.totalorder %s2114_s1, %s1903_s21  ;;  %p1907_p1 = scmp.lt.u32.totalorder %s1903_s21, %s2114_s1 }
   0x8   :  { %p1909_p2 = pnand %p1907_p1, %p1904_p0 }
   0xa   :  { %1912 = shalt.err (!%p1909_p2)
}
   0xb   :  { %s1913_s26 = scalar_lea.vmem %s30_s16, 1024  ;;  %p1918_p4 = scmp.lt.s32.totalorder %s30_s16, %s30_s16 }
   0xc   :  { %p1914_p3 = scmp.ne.s32.totalorder %s30_s16, %s1913_s26  ;;  %p1919_p5 = scmp.lt.s32.totalorder %s1913_s26, %s1913_s26 }
   0xe   :  { %p1920_p6 = por %p1919_p5, %p1918_p4 }
  0x10   :  { %p1921_p7 = pnand %p1920_p6, %p1914_p3 }
  0x12   :  { %1924 = shalt.err (!%p1921_p7)
}
  0x13   :  { %32 = dma.hbm_to_vmem [thread:$0]  %s2114_s1, 1024, %s30_s16, [#allocation6]  }
  0x14   :  { %s1925_s5 = scalar_lea.hbm %s2113_s0, 1024 }
  0x15   :  { %p1926_p8 = scmp.ne.s32.totalorder %s2113_s0, %s1925_s5  ;;  %p1929_p9 = scmp.lt.u32.totalorder %s1925_s5, %s2113_s0 }
  0x17   :  { %p1931_p10 = pnand %p1929_p9, %p1926_p8 }
  0x19   :  { %1934 = shalt.err (!%p1931_p10)
}
  0x1a   :  { %s1935_s10 = scalar_lea.vmem %s20_s18, 1024  ;;  %p1940_p12 = scmp.lt.s32.totalorder %s20_s18, %s20_s18 }
  0x1b   :  { %p1936_p11 = scmp.ne.s32.totalorder %s20_s18, %s1935_s10  ;;  %p1941_p13 = scmp.lt.s32.totalorder %s1935_s10, %s1935_s10 }
  0x1d   :  { %p1942_p0 = por %p1941_p13, %p1940_p12 }
  0x1f   :  { %p1943_p1 = pnand %p1942_p0, %p1936_p11 }
  0x21   :  { %1946 = shalt.err (!%p1943_p1)
}
  0x22   :  { %22 = dma.hbm_to_vmem [thread:$0]  %s2113_s0, 1024, %s20_s18, [#allocation3]  }
  0x23   :  { %s2023_s12 = smov [#allocation7]   ;;  %s1947_s16 = scalar_lea.hbm %s2115_s2, 8192 }
  0x24   :  { %s38_s13 = sshll.u32 %s2023_s12, 4  ;;  %p1948_p2 = scmp.ne.s32.totalorder %s2115_s2, %s1947_s16  ;;  %s39_s13 = int_to_ptr.vmem [resolvable:$true] %s38_s13 }
  0x25   :  { %p1951_p3 = scmp.lt.u32.totalorder %s1947_s16, %s2115_s2 }
  0x27   :  { %p1953_p4 = pnand %p1951_p3, %p1948_p2 }
  0x29   :  { %1956 = shalt.err (!%p1953_p4)
}
  0x2a   :  { %s1957_s22 = scalar_lea.vmem %s39_s13, 8192  ;;  %p1962_p6 = scmp.lt.s32.totalorder %s39_s13, %s39_s13 }
  0x2b   :  { %p1958_p5 = scmp.ne.s32.totalorder %s39_s13, %s1957_s22  ;;  %p1963_p7 = scmp.lt.s32.totalorder %s1957_s22, %s1957_s22 }
  0x2d   :  { %p1964_p8 = por %p1963_p7, %p1962_p6 }
  0x2f   :  { %p1965_p9 = pnand %p1964_p8, %p1958_p5 }
  0x31   :  { %1968 = shalt.err (!%p1965_p9)
}
  0x32   :  { %s2024_s0 = smov 64   ;;  %s2025_s18 = smov 4  }
  0x33   :  { %44 = dma.hbm_to_vmem [thread:$0]  %s2115_s2, 8192, %s39_s13, [#allocation6], %s2024_s0, %s2024_s0, %s2025_s18  }
  0x34   :  { %s2026_s25 = smov [#allocation8]   ;;  %s1969_s29 = scalar_lea.hbm %s2116_s3, 8192 }
  0x35   :  { %s50_s26 = sshll.u32 %s2026_s25, 4  ;;  %p1970_p10 = scmp.ne.s32.totalorder %s2116_s3, %s1969_s29  ;;  %s51_s26 = int_to_ptr.vmem [resolvable:$true] %s50_s26 }
  0x36   :  { %p1973_p11 = scmp.lt.u32.totalorder %s1969_s29, %s2116_s3 }
  0x38   :  { %p1975_p12 = pnand %p1973_p11, %p1970_p10 }
  0x3a   :  { %1978 = shalt.err (!%p1975_p12)
}
  0x3b   :  { %s1979_s8 = scalar_lea.vmem %s51_s26, 8192  ;;  %p1984_p0 = scmp.lt.s32.totalorder %s51_s26, %s51_s26 }
  0x3c   :  { %p1980_p13 = scmp.ne.s32.totalorder %s51_s26, %s1979_s8  ;;  %p1985_p1 = scmp.lt.s32.totalorder %s1979_s8, %s1979_s8 }
  0x3e   :  { %p1986_p2 = por %p1985_p1, %p1984_p0 }
  0x40   :  { %p1987_p3 = pnand %p1986_p2, %p1980_p13 }
  0x42   :  { %1990 = shalt.err (!%p1987_p3)
}
  0x43   :  { %56 = dma.hbm_to_vmem [thread:$0]  %s2116_s3, 8192, %s51_s26, [#allocation9], %s2024_s0, %s2024_s0, %s2025_s18  }
  0x44   :  { %2013 = dma.done.wait [#allocation3], 1024  }
  0x45   :  { %2014 = vsyncadd [#allocation3], 4294966272 }
  0x46   :  { %2015 = dma.done.wait [#allocation6], 9216  }
  0x47   :  { %2016 = vsyncadd [#allocation6], 4294958080 }
  0x48   :  { %2017 = dma.done.wait [#allocation9], 8192  }
  0x49   :  { %2018 = vsyncadd [#allocation9], 4294959104  ;;  %v1775_v0 = vld [vmem:[#allocation8 + $0x40] sm:$0xff]   ;;  %v1779_v4 = vld [vmem:[#allocation8 + $0x48] sm:$0xff]   ;;  %s2027_s3 = smov [#allocation10]  }
  0x4a   :  { %v1776_v1 = vld [vmem:[#allocation8 + $0xc0] sm:$0xff]   ;;  %1592 = vmatprep.subr.bf16.mxu0 %v1775_v0  ;;  %v1780_v5 = vld [vmem:[#allocation8 + $0xc8] sm:$0xff]   ;;  %v1783_v8 = vld [vmem:[#allocation8 + $0x50] sm:$0xff]   ;;  %s1453_s10 = sshll.u32 %s2027_s3, 4  ;;  %s1454_s10 = int_to_ptr.vmem [resolvable:$true] %s1453_s10 }
  0x4b   :  { %v1777_v2 = vld [vmem:[#allocation8] sm:$0xff]   ;;  %1614 = vmatprep.subr.bf16.mxu1 %v1776_v1  ;;  %v1781_v6 = vld [vmem:[#allocation8 + $0x8] sm:$0xff]   ;;  %v1784_v9 = vld [vmem:[#allocation8 + $0xd0] sm:$0xff]   ;;  %s1991_s1 = scalar_lea.vmem %s1454_s10, 128  ;;  %p1996_p5 = scmp.lt.s32.totalorder %s1454_s10, %s1454_s10 }
  0x4c   :  { %v1778_v3 = vld [vmem:[#allocation8 + $0x80] sm:$0xff]   ;;  %1593 = vmatpush3.bf16.msra.mxu0 %v1777_v2  ;;  %v1782_v7 = vld [vmem:[#allocation8 + $0x88] sm:$0xff]   ;;  %v1785_v10 = vld [vmem:[#allocation8 + $0x10] sm:$0xff]   ;;  %p1992_p4 = scmp.ne.s32.totalorder %s1454_s10, %s1991_s1  ;;  %p1997_p6 = scmp.lt.s32.totalorder %s1991_s1, %s1991_s1 }
  0x4d   :  { %1615 = vmatpush3.bf16.msra.mxu1 %v1778_v3  ;;  %1594 = vmatprep.subr.bf16.mxu0 %v1779_v4  ;;  %v1786_v11 = vld [vmem:[#allocation8 + $0x90] sm:$0xff]   ;;  %v1787_v12 = vld [vmem:[#allocation8 + $0x58] sm:$0xff]   ;;  %v1791_v16 = vld [vmem:[#allocation8 + $0x60] sm:$0xff]  }
  0x4e   :  { %1616 = vmatprep.subr.bf16.mxu1 %v1780_v5  ;;  %v1788_v13 = vld [vmem:[#allocation8 + $0xd8] sm:$0xff]   ;;  %v1792_v17 = vld [vmem:[#allocation8 + $0xe0] sm:$0xff]   ;;  %v1795_v20 = vld [vmem:[#allocation8 + $0x68] sm:$0xff]   ;;  %p1998_p7 = por %p1997_p6, %p1996_p5 }
  0x4f   :  { %v1789_v14 = vld [vmem:[#allocation8 + $0x18] sm:$0xff]   ;;  %v1793_v18 = vld [vmem:[#allocation8 + $0x20] sm:$0xff]   ;;  %v1796_v21 = vld [vmem:[#allocation8 + $0xe8] sm:$0xff]  }
  0x50   :  { %1595 = vmatpush3.bf16.msra.mxu0 %v1781_v6  ;;  %v1790_v15 = vld [vmem:[#allocation8 + $0x98] sm:$0xff]   ;;  %v1794_v19 = vld [vmem:[#allocation8 + $0xa0] sm:$0xff]   ;;  %v1797_v22 = vld [vmem:[#allocation8 + $0x28] sm:$0xff]   ;;  %p1999_p8 = pnand %p1998_p7, %p1992_p4 }
  0x51   :  { %1617 = vmatpush3.bf16.msra.mxu1 %v1782_v7  ;;  %1596 = vmatprep.subr.bf16.mxu0 %v1783_v8  ;;  %v1798_v23 = vld [vmem:[#allocation8 + $0xa8] sm:$0xff]   ;;  %v1799_v24 = vld [vmem:[#allocation8 + $0x70] sm:$0xff]   ;;  %v1803_v28 = vld [vmem:[#allocation8 + $0x78] sm:$0xff]  }
  0x52   :  { %1618 = vmatprep.subr.bf16.mxu1 %v1784_v9  ;;  %v1800_v25 = vld [vmem:[#allocation8 + $0xf0] sm:$0xff]   ;;  %v1804_v29 = vld [vmem:[#allocation8 + $0xf8] sm:$0xff]   ;;  %v87_v32 = vld [vmem:[#allocation5 + $0x8] sm:$0xff] }
  0x53   :  { %v1801_v26 = vld [vmem:[#allocation8 + $0x30] sm:$0xff]   ;;  %v1805_v30 = vld [vmem:[#allocation8 + $0x38] sm:$0xff]   ;;  %v86_v34 = vld [vmem:[#allocation5] sm:$0xff]  ;;  %v95_v35 = vpack.c.bf16 %v87_v32, %v87_v32 }
  0x54   :  { %1597 = vmatpush3.bf16.msra.mxu0 %v1785_v10  ;;  %v1802_v27 = vld [vmem:[#allocation8 + $0xb0] sm:$0xff]   ;;  %v1806_v31 = vld [vmem:[#allocation8 + $0xb8] sm:$0xff]   ;;  %v94_v37 = vpack.c.bf16 %v86_v34, %v86_v34  ;;  %v1807_v40 = vld [vmem:[#allocation8 + $0x140] sm:$0xff]  }
  0x55   :  { %1619 = vmatpush3.bf16.msra.mxu1 %v1786_v11  ;;  %1598 = vmatprep.subr.bf16.mxu0 %v1787_v12  ;;  %v89_v33 = vld [vmem:[#allocation5 + $0x18] sm:$0xff]  ;;  %v88_v38 = vld [vmem:[#allocation5 + $0x10] sm:$0xff]  ;;  %v1808_v41 = vld [vmem:[#allocation8 + $0x1c0] sm:$0xff]  }
  0x56   :  { %1620 = vmatprep.subr.bf16.mxu1 %v1788_v13  ;;  %v97_v36 = vpack.c.bf16 %v89_v33, %v89_v33  ;;  %v96_v39 = vpack.c.bf16 %v88_v38, %v88_v38  ;;  %774 = vmatprep.mubr.bf16.mxu0 %v95_v35  ;;  %v1809_v42 = vld [vmem:[#allocation8 + $0x100] sm:$0xff]   ;;  %v1811_v44 = vld [vmem:[#allocation8 + $0x148] sm:$0xff]   ;;  %v1815_v48 = vld [vmem:[#allocation8 + $0x150] sm:$0xff]  }
  0x57   :  { %v1810_v43 = vld [vmem:[#allocation8 + $0x180] sm:$0xff]   ;;  %v1812_v45 = vld [vmem:[#allocation8 + $0x1c8] sm:$0xff]   ;;  %v1816_v49 = vld [vmem:[#allocation8 + $0x1d0] sm:$0xff]  }
  0x58   :  { %1599 = vmatpush3.bf16.msra.mxu0 %v1789_v14  ;;  %814 = vmatprep.mubr.bf16.mxu1 %v97_v36  ;;  %v1813_v46 = vld [vmem:[#allocation8 + $0x108] sm:$0xff]   ;;  %v1817_v50 = vld [vmem:[#allocation8 + $0x110] sm:$0xff]   ;;  %v1819_v52 = vld [vmem:[#allocation8 + $0x158] sm:$0xff]  }
  0x59   :  { %1621 = vmatpush3.bf16.msra.mxu1 %v1790_v15  ;;  %1600 = vmatprep.subr.bf16.mxu0 %v1791_v16  ;;  %v1814_v47 = vld [vmem:[#allocation8 + $0x188] sm:$0xff]   ;;  %v1818_v51 = vld [vmem:[#allocation8 + $0x190] sm:$0xff]   ;;  %v1820_v53 = vld [vmem:[#allocation8 + $0x1d8] sm:$0xff]  }
  0x5a   :  { %1622 = vmatprep.subr.bf16.mxu1 %v1792_v17  ;;  %v1821_v54 = vld [vmem:[#allocation8 + $0x118] sm:$0xff]   ;;  %v1823_v56 = vld [vmem:[#allocation8 + $0x160] sm:$0xff]   ;;  %v1827_v60 = vld [vmem:[#allocation8 + $0x168] sm:$0xff]  }
  0x5b   :  { %v1822_v55 = vld [vmem:[#allocation8 + $0x198] sm:$0xff]   ;;  %v1824_v57 = vld [vmem:[#allocation8 + $0x1e0] sm:$0xff]   ;;  %v1828_v61 = vld [vmem:[#allocation8 + $0x1e8] sm:$0xff]  }
  0x5c   :  { %1601 = vmatpush3.bf16.msra.mxu0 %v1793_v18  ;;  %v1825_v58 = vld [vmem:[#allocation8 + $0x120] sm:$0xff]   ;;  %v1829_v62 = vld [vmem:[#allocation8 + $0x128] sm:$0xff]   ;;  %v1831_v0 = vld [vmem:[#allocation8 + $0x170] sm:$0xff]  }
  0x5d   :  { %1623 = vmatpush3.bf16.msra.mxu1 %v1794_v19  ;;  %1602 = vmatprep.subr.bf16.mxu0 %v1795_v20  ;;  %v1826_v59 = vld [vmem:[#allocation8 + $0x1a0] sm:$0xff]   ;;  %v1830_v63 = vld [vmem:[#allocation8 + $0x1a8] sm:$0xff]   ;;  %v1832_v1 = vld [vmem:[#allocation8 + $0x1f0] sm:$0xff]  }
  0x5e   :  { %1624 = vmatprep.subr.bf16.mxu1 %v1796_v21  ;;  %v1833_v2 = vld [vmem:[#allocation8 + $0x130] sm:$0xff]   ;;  %v1835_v4 = vld [vmem:[#allocation8 + $0x178] sm:$0xff]   ;;  %v91_v8 = vld [vmem:[#allocation5 + $0x28] sm:$0xff] }
  0x5f   :  { %v1834_v3 = vld [vmem:[#allocation8 + $0x1b0] sm:$0xff]   ;;  %v1836_v5 = vld [vmem:[#allocation8 + $0x1f8] sm:$0xff]   ;;  %v99_v10 = vpack.c.bf16 %v91_v8, %v91_v8  ;;  %v90_v12 = vld [vmem:[#allocation5 + $0x20] sm:$0xff] }
  0x60   :  { %1603 = vmatpush3.bf16.msra.mxu0 %v1797_v22  ;;  %v1837_v6 = vld [vmem:[#allocation8 + $0x138] sm:$0xff]   ;;  %v92_v13 = vld [vmem:[#allocation5 + $0x30] sm:$0xff]  ;;  %v98_v14 = vpack.c.bf16 %v90_v12, %v90_v12  ;;  %v1839_v16 = vld [vmem:[#allocation7 + $0x40] sm:$0xff]  }
  0x61   :  { %1625 = vmatpush3.bf16.msra.mxu1 %v1798_v23  ;;  %1604 = vmatprep.subr.bf16.mxu0 %v1799_v24  ;;  %v1838_v7 = vld [vmem:[#allocation8 + $0x1b8] sm:$0xff]   ;;  %v100_v15 = vpack.c.bf16 %v92_v13, %v92_v13  ;;  %v1840_v17 = vld [vmem:[#allocation7 + $0xc0] sm:$0xff]   ;;  %v1843_v20 = vld [vmem:[#allocation7 + $0x48] sm:$0xff]  }
  0x62   :  { %1626 = vmatprep.subr.bf16.mxu1 %v1800_v25  ;;  %v93_v9 = vld [vmem:[#allocation5 + $0x38] sm:$0xff]  ;;  %v1841_v18 = vld [vmem:[#allocation7] sm:$0xff]   ;;  %v1844_v21 = vld [vmem:[#allocation7 + $0xc8] sm:$0xff]  }
  0x63   :  { %v101_v11 = vpack.c.bf16 %v93_v9, %v93_v9  ;;  %v1842_v19 = vld [vmem:[#allocation7 + $0x80] sm:$0xff]   ;;  %v1845_v22 = vld [vmem:[#allocation7 + $0x8] sm:$0xff]   ;;  %v1847_v24 = vld [vmem:[#allocation7 + $0x50] sm:$0xff]  }
  0x64   :  { %1605 = vmatpush3.bf16.msra.mxu0 %v1801_v26  ;;  %v1846_v23 = vld [vmem:[#allocation7 + $0x88] sm:$0xff]   ;;  %v1848_v25 = vld [vmem:[#allocation7 + $0xd0] sm:$0xff]   ;;  %v1855_v32 = vld [vmem:[#allocation7 + $0x60] sm:$0xff]  }
  0x65   :  { %1627 = vmatpush3.bf16.msra.mxu1 %v1802_v27  ;;  %1606 = vmatprep.subr.bf16.mxu0 %v1803_v28  ;;  %v1849_v26 = vld [vmem:[#allocation7 + $0x10] sm:$0xff]   ;;  %v1851_v28 = vld [vmem:[#allocation7 + $0x58] sm:$0xff]   ;;  %v1856_v33 = vld [vmem:[#allocation7 + $0xe0] sm:$0xff]  }
  0x66   :  { %1628 = vmatprep.subr.bf16.mxu1 %v1804_v29  ;;  %v1850_v27 = vld [vmem:[#allocation7 + $0x90] sm:$0xff]   ;;  %v1852_v29 = vld [vmem:[#allocation7 + $0xd8] sm:$0xff]   ;;  %v1857_v34 = vld [vmem:[#allocation7 + $0x20] sm:$0xff]  }
  0x67   :  { %v1858_v35 = vld [vmem:[#allocation7 + $0xa0] sm:$0xff]   ;;  %v1859_v36 = vld [vmem:[#allocation7 + $0x68] sm:$0xff]  }
  0x68   :  { %1607 = vmatpush3.bf16.msra.mxu0 %v1805_v30  ;;  %v1853_v30 = vld [vmem:[#allocation7 + $0x18] sm:$0xff]   ;;  %v1861_v38 = vld [vmem:[#allocation7 + $0x28] sm:$0xff]   ;;  %v1887_v8 = vld [vmem:[#allocation7 + $0x160] sm:$0xff]  }
  0x69   :  { %1629 = vmatpush3.bf16.msra.mxu1 %v1806_v31  ;;  %1636 = vmatprep.subr.bf16.mxu0 %v1807_v40  ;;  %v1854_v31 = vld [vmem:[#allocation7 + $0x98] sm:$0xff]   ;;  %v1863_v40 = vld [vmem:[#allocation7 + $0x70] sm:$0xff]   ;;  %v1888_v9 = vld [vmem:[#allocation7 + $0x1e0] sm:$0xff]  }
  0x6a   :  { %1658 = vmatprep.subr.bf16.mxu1 %v1808_v41  ;;  %v1864_v41 = vld [vmem:[#allocation7 + $0xf0] sm:$0xff]   ;;  %v1891_v12 = vld [vmem:[#allocation7 + $0x168] sm:$0xff]  }
  0x6b   :  { %775 = vmatmul.mubr.bf16.vlgmr.msra.gmra.mrb[0].mxu0 %v94_v37  ;;  %v1860_v37 = vld [vmem:[#allocation7 + $0xe8] sm:$0xff]  }
  0x6c   :  { %815 = vmatmul.mubr.bf16.vlgmr.msra.gmra.mrb[0].mxu1 %v96_v39  ;;  %1637 = vmatpush3.bf16.msra.mxu0 %v1809_v42  ;;  %v1862_v39 = vld [vmem:[#allocation7 + $0xa8] sm:$0xff]   ;;  %v1865_v42 = vld [vmem:[#allocation7 + $0x30] sm:$0xff]  }
  0x6d   :  { %1659 = vmatpush3.bf16.msra.mxu1 %v1810_v43  ;;  %1638 = vmatprep.subr.bf16.mxu0 %v1811_v44  ;;  %v1866_v43 = vld [vmem:[#allocation7 + $0xb0] sm:$0xff]   ;;  %v1867_v44 = vld [vmem:[#allocation7 + $0x78] sm:$0xff]   ;;  %v1892_v13 = vld [vmem:[#allocation7 + $0x1e8] sm:$0xff]  }
  0x6e   :  { %1660 = vmatprep.subr.bf16.mxu1 %v1812_v45  ;;  %854 = vmatprep.mubr.bf16.mxu0 %v99_v10  ;;  %v1868_v45 = vld [vmem:[#allocation7 + $0xf8] sm:$0xff]   ;;  %v1889_v10 = vld [vmem:[#allocation7 + $0x120] sm:$0xff]  }
  0x6f   :  { %894 = vmatprep.mubr.bf16.mxu1 %v101_v11  ;;  %v1890_v11 = vld [vmem:[#allocation7 + $0x1a0] sm:$0xff]  }
  0x70   :  { %1639 = vmatpush3.bf16.msra.mxu0 %v1813_v46  ;;  %v1869_v46 = vld [vmem:[#allocation7 + $0x38] sm:$0xff]  }
  0x71   :  { %1661 = vmatpush3.bf16.msra.mxu1 %v1814_v47  ;;  %1640 = vmatprep.subr.bf16.mxu0 %v1815_v48  ;;  %v1870_v47 = vld [vmem:[#allocation7 + $0xb8] sm:$0xff]   ;;  %v71_v48 = vld [vmem:[#allocation2 + $0x8] sm:$0xff] }
  0x72   :  { %1662 = vmatprep.subr.bf16.mxu1 %v1816_v49  ;;  %v79_v49 = vpack.c.bf16 %v71_v48, %v71_v48 }
  0x74   :  { %1641 = vmatpush3.bf16.msra.mxu0 %v1817_v50  ;;  %v73_v50 = vld [vmem:[#allocation2 + $0x18] sm:$0xff] }
  0x75   :  { %1663 = vmatpush3.bf16.msra.mxu1 %v1818_v51  ;;  %1642 = vmatprep.subr.bf16.mxu0 %v1819_v52  ;;  %v70_v51 = vld [vmem:[#allocation2] sm:$0xff]  ;;  %v72_v52 = vld [vmem:[#allocation2 + $0x10] sm:$0xff] }
  0x76   :  { %1664 = vmatprep.subr.bf16.mxu1 %v1820_v53  ;;  %v81_v53 = vpack.c.bf16 %v73_v50, %v73_v50 }
  0x78   :  { %1643 = vmatpush3.bf16.msra.mxu0 %v1821_v54  ;;  %v78_v54 = vpack.c.bf16 %v70_v51, %v70_v51 }
  0x79   :  { %1665 = vmatpush3.bf16.msra.mxu1 %v1822_v55  ;;  %1644 = vmatprep.subr.bf16.mxu0 %v1823_v56  ;;  %v80_v55 = vpack.c.bf16 %v72_v52, %v72_v52  ;;  %v1871_v56 = vld [vmem:[#allocation7 + $0x140] sm:$0xff]  }
  0x7a   :  { %1666 = vmatprep.subr.bf16.mxu1 %v1824_v57  ;;  %v1872_v57 = vld [vmem:[#allocation7 + $0x1c0] sm:$0xff]  }
  0x7c   :  { %1645 = vmatpush3.bf16.msra.mxu0 %v1825_v58  ;;  %v1873_v58 = vld [vmem:[#allocation7 + $0x100] sm:$0xff]  }
  0x7d   :  { %1667 = vmatpush3.bf16.msra.mxu1 %v1826_v59  ;;  %1646 = vmatprep.subr.bf16.mxu0 %v1827_v60  ;;  %v1874_v59 = vld [vmem:[#allocation7 + $0x180] sm:$0xff]   ;;  %v1875_v60 = vld [vmem:[#allocation7 + $0x148] sm:$0xff]  }
  0x7e   :  { %1668 = vmatprep.subr.bf16.mxu1 %v1828_v61  ;;  %v1876_v61 = vld [vmem:[#allocation7 + $0x1c8] sm:$0xff]  }
  0x80   :  { %1647 = vmatpush3.bf16.msra.mxu0 %v1829_v62  ;;  %v1877_v62 = vld [vmem:[#allocation7 + $0x108] sm:$0xff]  }
  0x81   :  { %1669 = vmatpush3.bf16.msra.mxu1 %v1830_v63  ;;  %1648 = vmatprep.subr.bf16.mxu0 %v1831_v0  ;;  %v1878_v63 = vld [vmem:[#allocation7 + $0x188] sm:$0xff]   ;;  %v1879_v0 = vld [vmem:[#allocation7 + $0x150] sm:$0xff]  }
  0x82   :  { %1670 = vmatprep.subr.bf16.mxu1 %v1832_v1  ;;  %v1880_v1 = vld [vmem:[#allocation7 + $0x1d0] sm:$0xff]  }
  0x84   :  { %1649 = vmatpush3.bf16.msra.mxu0 %v1833_v2  ;;  %v1881_v2 = vld [vmem:[#allocation7 + $0x110] sm:$0xff]  }
  0x85   :  { %1671 = vmatpush3.bf16.msra.mxu1 %v1834_v3  ;;  %1650 = vmatprep.subr.bf16.mxu0 %v1835_v4  ;;  %v1882_v3 = vld [vmem:[#allocation7 + $0x190] sm:$0xff]   ;;  %v1883_v4 = vld [vmem:[#allocation7 + $0x158] sm:$0xff]  }
  0x86   :  { %1672 = vmatprep.subr.bf16.mxu1 %v1836_v5  ;;  %v1884_v5 = vld [vmem:[#allocation7 + $0x1d8] sm:$0xff]  }
  0x88   :  { %1651 = vmatpush3.bf16.msra.mxu0 %v1837_v6  ;;  %v1885_v6 = vld [vmem:[#allocation7 + $0x118] sm:$0xff]  }
  0x89   :  { %1673 = vmatpush3.bf16.msra.mxu1 %v1838_v7  ;;  %1680 = vmatprep.subr.bf16.mxu0 %v1839_v16  ;;  %v1886_v7 = vld [vmem:[#allocation7 + $0x198] sm:$0xff]   ;;  %v1895_v16 = vld [vmem:[#allocation7 + $0x170] sm:$0xff]  }
  0x8a   :  { %1702 = vmatprep.subr.bf16.mxu1 %v1840_v17  ;;  %v1896_v17 = vld [vmem:[#allocation7 + $0x1f0] sm:$0xff]  }
  0x8b   :  { %855 = vmatmul.mubr.bf16.vlgmr.msra.gmra.mrb[4].mxu0 %v98_v14  ;;  %v1893_v14 = vld [vmem:[#allocation7 + $0x128] sm:$0xff]  }
  0x8c   :  { %895 = vmatmul.mubr.bf16.vlgmr.msra.gmra.mrb[4].mxu1 %v100_v15  ;;  %1681 = vmatpush3.bf16.msra.mxu0 %v1841_v18  ;;  %v1894_v15 = vld [vmem:[#allocation7 + $0x1a8] sm:$0xff]   ;;  %v1897_v18 = vld [vmem:[#allocation7 + $0x130] sm:$0xff]  }
  0x8d   :  { %1703 = vmatpush3.bf16.msra.mxu1 %v1842_v19  ;;  %1682 = vmatprep.subr.bf16.mxu0 %v1843_v20  ;;  %v1898_v19 = vld [vmem:[#allocation7 + $0x1b0] sm:$0xff]   ;;  %v1899_v20 = vld [vmem:[#allocation7 + $0x178] sm:$0xff]  }
  0x8e   :  { %1704 = vmatprep.subr.bf16.mxu1 %v1844_v21  ;;  %1318 = vmatprep.mubr.bf16.mxu0 %v79_v49  ;;  %v1900_v21 = vld [vmem:[#allocation7 + $0x1f8] sm:$0xff]  }
  0x8f   :  { %1358 = vmatprep.mubr.bf16.mxu1 %v81_v53 }
  0x90   :  { %1683 = vmatpush3.bf16.msra.mxu0 %v1845_v22  ;;  %v1901_v22 = vld [vmem:[#allocation7 + $0x138] sm:$0xff]  }
  0x91   :  { %1705 = vmatpush3.bf16.msra.mxu1 %v1846_v23  ;;  %1684 = vmatprep.subr.bf16.mxu0 %v1847_v24  ;;  %v1902_v23 = vld [vmem:[#allocation7 + $0x1b8] sm:$0xff]   ;;  %v75_v24 = vld [vmem:[#allocation2 + $0x28] sm:$0xff] }
  0x92   :  { %1706 = vmatprep.subr.bf16.mxu1 %v1848_v25  ;;  %v77_v25 = vld [vmem:[#allocation2 + $0x38] sm:$0xff] }
  0x94   :  { %1685 = vmatpush3.bf16.msra.mxu0 %v1849_v26  ;;  %v74_v26 = vld [vmem:[#allocation2 + $0x20] sm:$0xff] }
  0x95   :  { %1707 = vmatpush3.bf16.msra.mxu1 %v1850_v27  ;;  %1686 = vmatprep.subr.bf16.mxu0 %v1851_v28  ;;  %v83_v27 = vpack.c.bf16 %v75_v24, %v75_v24  ;;  %v85_v28 = vpack.c.bf16 %v77_v25, %v77_v25 }
  0x96   :  { %1708 = vmatprep.subr.bf16.mxu1 %v1852_v29  ;;  %v82_v29 = vpack.c.bf16 %v74_v26, %v74_v26 }
  0x98   :  { %1687 = vmatpush3.bf16.msra.mxu0 %v1853_v30  ;;  %v76_v30 = vld [vmem:[#allocation2 + $0x30] sm:$0xff] }
  0x99   :  { %1709 = vmatpush3.bf16.msra.mxu1 %v1854_v31  ;;  %1688 = vmatprep.subr.bf16.mxu0 %v1855_v32  ;;  %v84_v31 = vpack.c.bf16 %v76_v30, %v76_v30 }
  0x9a   :  { %1710 = vmatprep.subr.bf16.mxu1 %v1856_v33 }
  0x9c   :  { %1689 = vmatpush3.bf16.msra.mxu0 %v1857_v34 }
  0x9d   :  { %1711 = vmatpush3.bf16.msra.mxu1 %v1858_v35  ;;  %1690 = vmatprep.subr.bf16.mxu0 %v1859_v36 }
  0x9e   :  { %1712 = vmatprep.subr.bf16.mxu1 %v1860_v37 }
  0xa0   :  { %1691 = vmatpush3.bf16.msra.mxu0 %v1861_v38 }
  0xa1   :  { %1713 = vmatpush3.bf16.msra.mxu1 %v1862_v39  ;;  %1692 = vmatprep.subr.bf16.mxu0 %v1863_v40 }
  0xa2   :  { %1714 = vmatprep.subr.bf16.mxu1 %v1864_v41 }
  0xa4   :  { %1693 = vmatpush3.bf16.msra.mxu0 %v1865_v42 }
  0xa5   :  { %1715 = vmatpush3.bf16.msra.mxu1 %v1866_v43  ;;  %1694 = vmatprep.subr.bf16.mxu0 %v1867_v44 }
  0xa6   :  { %1716 = vmatprep.subr.bf16.mxu1 %v1868_v45 }
  0xa8   :  { %1695 = vmatpush3.bf16.msra.mxu0 %v1869_v46 }
  0xa9   :  { %1717 = vmatpush3.bf16.msra.mxu1 %v1870_v47  ;;  %1724 = vmatprep.subr.bf16.mxu0 %v1871_v56 }
  0xaa   :  { %1746 = vmatprep.subr.bf16.mxu1 %v1872_v57 }
  0xab   :  { %1319 = vmatmul.mubr.bf16.vlgmr.msra.gmra.mrb[8].mxu0 %v78_v54 }
  0xac   :  { %1359 = vmatmul.mubr.bf16.vlgmr.msra.gmra.mrb[8].mxu1 %v80_v55  ;;  %1725 = vmatpush3.bf16.msra.mxu0 %v1873_v58 }
  0xad   :  { %1747 = vmatpush3.bf16.msra.mxu1 %v1874_v59  ;;  %1726 = vmatprep.subr.bf16.mxu0 %v1875_v60 }
  0xae   :  { %1748 = vmatprep.subr.bf16.mxu1 %v1876_v61  ;;  %1398 = vmatprep.mubr.bf16.mxu0 %v83_v27 }
  0xaf   :  { %1438 = vmatprep.mubr.bf16.mxu1 %v85_v28 }
  0xb0   :  { %1727 = vmatpush3.bf16.msra.mxu0 %v1877_v62 }
  0xb1   :  { %1749 = vmatpush3.bf16.msra.mxu1 %v1878_v63  ;;  %1728 = vmatprep.subr.bf16.mxu0 %v1879_v0 }
  0xb2   :  { %1750 = vmatprep.subr.bf16.mxu1 %v1880_v1 }
  0xb4   :  { %1729 = vmatpush3.bf16.msra.mxu0 %v1881_v2 }
  0xb5   :  { %1751 = vmatpush3.bf16.msra.mxu1 %v1882_v3  ;;  %1730 = vmatprep.subr.bf16.mxu0 %v1883_v4 }
  0xb6   :  { %1752 = vmatprep.subr.bf16.mxu1 %v1884_v5 }
  0xb8   :  { %1731 = vmatpush3.bf16.msra.mxu0 %v1885_v6 }
  0xb9   :  { %1753 = vmatpush3.bf16.msra.mxu1 %v1886_v7  ;;  %1732 = vmatprep.subr.bf16.mxu0 %v1887_v8 }
  0xba   :  { %1754 = vmatprep.subr.bf16.mxu1 %v1888_v9 }
  0xbc   :  { %1733 = vmatpush3.bf16.msra.mxu0 %v1889_v10 }
  0xbd   :  { %1755 = vmatpush3.bf16.msra.mxu1 %v1890_v11  ;;  %1734 = vmatprep.subr.bf16.mxu0 %v1891_v12 }
  0xbe   :  { %1756 = vmatprep.subr.bf16.mxu1 %v1892_v13 }
  0xc0   :  { %1735 = vmatpush3.bf16.msra.mxu0 %v1893_v14 }
  0xc1   :  { %1757 = vmatpush3.bf16.msra.mxu1 %v1894_v15  ;;  %1736 = vmatprep.subr.bf16.mxu0 %v1895_v16 }
  0xc2   :  { %1758 = vmatprep.subr.bf16.mxu1 %v1896_v17 }
  0xc4   :  { %1737 = vmatpush3.bf16.msra.mxu0 %v1897_v18 }
  0xc5   :  { %1759 = vmatpush3.bf16.msra.mxu1 %v1898_v19  ;;  %1738 = vmatprep.subr.bf16.mxu0 %v1899_v20 }
  0xc6   :  { %1760 = vmatprep.subr.bf16.mxu1 %v1900_v21 }
  0xc8   :  { %1739 = vmatpush3.bf16.msra.mxu0 %v1901_v22 }
  0xc9   :  { %1761 = vmatpush3.bf16.msra.mxu1 %v1902_v23 }
  0xcb   :  { %1399 = vmatmul.mubr.bf16.vlgmr.msra.gmra.mrb[12].mxu0 %v82_v29 }
  0xcc   :  { %1439 = vmatmul.mubr.bf16.vlgmr.msra.gmra.mrb[12].mxu1 %v84_v31 }
 0x13e   :  { %v1608_v32 = vpop.f32.mrb[0].mxu0 }
 0x13f   :  { %v1630_v33 = vpop.f32.mrb[0].mxu1  ;;  %v1609_v34 = vpop.f32.mrb[1].mxu0 }
 0x140   :  { %v1631_v35 = vpop.f32.mrb[1].mxu1  ;;  %v1610_v36 = vadd.f32 %v1609_v34, %v1608_v32  ;;  %v1611_v38 = vpop.f32.mrb[2].mxu0 }
 0x141   :  { %v1632_v37 = vadd.f32 %v1631_v35, %v1630_v33  ;;  %v1633_v39 = vpop.f32.mrb[2].mxu1  ;;  %v1612_v40 = vpop.f32.mrb[3].mxu0 }
 0x142   :  { %v1634_v41 = vpop.f32.mrb[3].mxu1 }
 0x143   :  { %v817_v42 = vadd.f32 %v1632_v37, %v1610_v36 }
 0x15e   :  { %v1652_v43 = vpop.f32.mrb[4].mxu0 }
 0x15f   :  { %v1674_v44 = vpop.f32.mrb[4].mxu1  ;;  %v1653_v45 = vpop.f32.mrb[5].mxu0 }
 0x160   :  { %v1654_v46 = vadd.f32 %v1653_v45, %v1652_v43  ;;  %v1675_v47 = vpop.f32.mrb[5].mxu1  ;;  %v1655_v48 = vpop.f32.mrb[6].mxu0 }
 0x161   :  { %v1676_v49 = vadd.f32 %v1675_v47, %v1674_v44  ;;  %v1677_v50 = vpop.f32.mrb[6].mxu1  ;;  %v1656_v51 = vpop.f32.mrb[7].mxu0 }
 0x162   :  { %v857_v52 = vadd.f32 %v1654_v46, %v817_v42  ;;  %v1678_v53 = vpop.f32.mrb[7].mxu1 }
 0x164   :  { %v897_v54 = vadd.f32 %v1676_v49, %v857_v52 }
 0x17e   :  { %v1696_v55 = vpop.f32.mrb[8].mxu0 }
 0x17f   :  { %v1718_v56 = vpop.f32.mrb[8].mxu1  ;;  %v1697_v57 = vpop.f32.mrb[9].mxu0 }
 0x180   :  { %v1698_v58 = vadd.f32 %v1697_v57, %v1696_v55  ;;  %v1719_v59 = vpop.f32.mrb[9].mxu1  ;;  %v1699_v60 = vpop.f32.mrb[10].mxu0 }
 0x181   :  { %v1720_v61 = vadd.f32 %v1719_v59, %v1718_v56  ;;  %v1721_v62 = vpop.f32.mrb[10].mxu1  ;;  %v1700_v63 = vpop.f32.mrb[11].mxu0 }
 0x182   :  { %v1321_v0 = vadd.f32 %v1698_v58, %v897_v54  ;;  %v1722_v1 = vpop.f32.mrb[11].mxu1 }
 0x184   :  { %v1361_v2 = vadd.f32 %v1720_v61, %v1321_v0 }
 0x19e   :  { %v1740_v3 = vpop.f32.mrb[12].mxu0 }
 0x19f   :  { %v1762_v4 = vpop.f32.mrb[12].mxu1  ;;  %v1741_v5 = vpop.f32.mrb[13].mxu0 }
 0x1a0   :  { %v1763_v6 = vpop.f32.mrb[13].mxu1  ;;  %v1742_v7 = vadd.f32 %v1741_v5, %v1740_v3  ;;  %v1743_v9 = vpop.f32.mrb[14].mxu0 }
 0x1a1   :  { %v1764_v8 = vadd.f32 %v1763_v6, %v1762_v4  ;;  %v1765_v10 = vpop.f32.mrb[14].mxu1  ;;  %v1744_v11 = vpop.f32.mrb[15].mxu0 }
 0x1a2   :  { %v1766_v12 = vpop.f32.mrb[15].mxu1  ;;  %v1401_v13 = vadd.f32 %v1742_v7, %v1361_v2 }
 0x1a4   :  { %v1441_v14 = vadd.f32 %v1764_v8, %v1401_v13 }
 0x1a6   :  { %1446 = vst [vmem:[#allocation10] sm:$0xff] %v1441_v14 }
 0x1a7   :  { %2002 = shalt.err (!%p1999_p8)
}
 0x1a8   :  { %s2003_s13 = scalar_lea.hbm %s2117_s4, 128 }
 0x1a9   :  { %p2004_p9 = scmp.ne.s32.totalorder %s2117_s4, %s2003_s13  ;;  %p2007_p10 = scmp.lt.u32.totalorder %s2003_s13, %s2117_s4 }
 0x1ab   :  { %p2009_p11 = pnand %p2007_p10, %p2004_p9 }
 0x1ad   :  { %2012 = shalt.err (!%p2009_p11)
}
 0x1ae   :  { %1456 = dma.vmem_to_hbm [thread:$0]  %s1454_s10, 128, %s2117_s4, [#allocation4]  }
 0x1af   :  { %2019 = dma.done.wait [#allocation4], 128  }
 0x1b0   :  { %2020 = vsyncadd [#allocation4], 4294967168 }
 0x1b1   :  { %1460 = vsyncpa [#allocation3], 1 }
 0x1b2   :  { %1461 = vsyncpa [#allocation6], 1 }
 0x1b3   :  { %1462 = vsyncpa [#allocation9], 1 }
 0x1b4   :  { %1463 = vsyncpa [#allocation4], 1 }

</bundles_post_ra>
